<compile_context>
chip_gen: v7x
topology: tpu7x:2x2x1
jax: 0.10.0
libtpu: 0.0.40
codegen_flags: <defaults>
</compile_context>

<pallas_src>
import jax
import jax.numpy as jnp
import numpy as np
from jax.experimental import pallas as pl
from jax.experimental.pallas import tpu as pltpu

# Module hyper-parameters (PyTorch defaults)
INPUT_SIZE  = 4
HIDDEN      = 32
NUM_LAYERS  = 2
NUM_DIR     = 2            # bidirectional
OUTPUT_SIZE = 919

H       = HIDDEN
DH      = 2 * H            # fused (fwd|bwd) hidden width            = 64
G       = 4 * DH           # fused gate width, 4 gates x 2 dirs      = 256
IN_PAD  = 8                # layer-0 input features padded 4 -> 8
OUT_PAD = 1024             # fc output padded 919 -> 1024 (lane-dense store)


# --------------------------------------------------------------------------------------
# Kernel
# --------------------------------------------------------------------------------------
def lstm_fc_kernel(x_ref, w0_ref, wmid_ref, wfc_ref, bias_ref, out_ref):
    """Fused 2-layer bidirectional LSTM recurrence + final Linear, fully VMEM-resident.

    x_ref    : (T*B, IN_PAD) bf16       time-major flattened input (row t*B+b = x[t, b])
    w0_ref   : (IN_PAD, 2G) bf16        [w0f | w0b]  layer-0 packed input->gate weights
    wmid_ref : (DH, 4G) bf16            [whh0 | wa1 | wb1 | whh1]
    wfc_ref  : (4H, OUT_PAD) bf16       fc weight (transposed, output-padded)
    bias_ref : (1, 2G + OUT_PAD) f32    [b0 | b1 | bfc]
    out_ref  : (B, OUT_PAD) f32

    Fused state layout: h, c are (B, DH) = [fwd lanes 0:H | bwd lanes H:2H].
    Gate column layout (PyTorch gate order, direction-minor):
      [i_f,i_b | f_f,f_b | g_f,g_b | o_f,o_b], each block DH wide.
    """
    B = out_ref.shape[0]
    T = x_ref.shape[0] // B
    bf16, f32 = jnp.bfloat16, jnp.float32

    # ---- unpack packed weights / biases (all slices are (8,128)-tile aligned).
    whh0 = wmid_ref[:, 0:G]
    w1   = wmid_ref[:, G:3 * G]          # [wa1 | wb1]
    whh1 = wmid_ref[:, 3 * G:]
    b0   = bias_ref[:, 0:G]
    b1   = bias_ref[:, G:2 * G]
    bfc  = bias_ref[:, 2 * G:]

    def run_layer(xp_fwd, xp_bwd, whh):
        # xp_fwd/xp_bwd: (T*B, G) f32 batched input projections (bias already folded into
        # xp_fwd).  Fused step s consumes xp_fwd rows of time s and xp_bwd rows of T-1-s.
        h = jnp.zeros((B, DH), f32)
        c = jnp.zeros((B, DH), f32)
        hs = []
        for s in range(T):                                  # fully unrolled, T static
            xp = xp_fwd[s * B:(s + 1) * B] + xp_bwd[(T - 1 - s) * B:(T - s) * B]
            gates = xp + jnp.dot(h.astype(bf16), whh,
                                 preferred_element_type=f32)          # (B, G)
            sif = jax.nn.sigmoid(gates[:, :2 * DH])         # [i | f]  (one 128-lane vreg)
            g   = jnp.tanh(gates[:, 2 * DH:3 * DH])         # g gate
            c   = sif[:, DH:2 * DH] * c + sif[:, :DH] * g   # f*c + i*g
            o   = jax.nn.sigmoid(gates[:, 3 * DH:])         # o gate (off the c sub-chain)
            h   = o * jnp.tanh(c)
            hs.append(h)
        return hs

    # ---- layer 0: ONE batched input projection for both directions (off the h->h chain).
    xp0 = jnp.dot(x_ref[...], w0_ref[...], preferred_element_type=f32)   # (T*B, 2G)
    hs0 = run_layer(xp0[:, :G] + b0, xp0[:, G:], whh0)
    # hs0[s] = [h0_fwd(t=s) | h0_bwd(t=T-1-s)]

    # ---- hoisted half of the final FC: depends only on layer 0, overlaps layer-1 recurrence.
    part_top = jnp.dot(hs0[T - 1].astype(bf16), wfc_ref[0:DH, :],
                       preferred_element_type=f32)                       # (B, OUT_PAD)

    # ---- layer 1: stack hs0 once, ONE batched input projection.
    #     xp1[s] = hs0[s] @ WA + hs0[T-1-s] @ WB (+ b1); WA/WB packed side-by-side in w1.
    hs0_flat = jnp.concatenate(hs0, axis=0).astype(bf16)                 # (T*B, DH)
    xp1 = jnp.dot(hs0_flat, w1, preferred_element_type=f32)              # (T*B, 2G)
    hs1 = run_layer(xp1[:, :G] + b1, xp1[:, G:], whh1)

    # ---- h_n concat in PyTorch order [l0_fwd, l0_bwd, l1_fwd, l1_bwd] -> Linear
    # (expressed as a split FC, no lane concat).
    out_ref[...] = (part_top
                    + jnp.dot(hs1[T - 1].astype(bf16), wfc_ref[DH:, :],
                              preferred_element_type=f32)
                    + bfc)


# --------------------------------------------------------------------------------------
# Wrapper
# --------------------------------------------------------------------------------------
def seq2seq_attention(x, kp):
    """x: (T, B, INPUT_SIZE) f32 -> (B, OUTPUT_SIZE) f32 (eval-mode forward)."""
    T, B, I = x.shape
    x_pad = jnp.pad(x.astype(jnp.float32), ((0, 0), (0, 0), (0, IN_PAD - I)))
    x_flat = x_pad.reshape(T * B, IN_PAD).astype(jnp.bfloat16)
    vmem = pl.BlockSpec(memory_space=pltpu.MemorySpace.VMEM)
    out = pl.pallas_call(
        lstm_fc_kernel,
        out_shape=jax.ShapeDtypeStruct((B, OUT_PAD), jnp.float32),
        in_specs=[vmem] * 5,
        out_specs=vmem,
    )(x_flat, kp["w0"], kp["wmid"], kp["wfc"], kp["bias"])
    return out[:, :OUTPUT_SIZE]


# --------------------------------------------------------------------------------------
# Parameters: PyTorch-layout init + packing into the fused kernel layout
# --------------------------------------------------------------------------------------
def init_params(key):
    """Deterministic synthetic parameters, PyTorch-style uniform init, PyTorch layout."""
    k_lstm = 1.0 / float(np.sqrt(H))
    keys = jax.random.split(key, 4 * NUM_LAYERS * NUM_DIR + 2)
    lstm, ki = [], 0
    for layer in range(NUM_LAYERS):
        in_dim = INPUT_SIZE if layer == 0 else H * NUM_DIR
        for _d in range(NUM_DIR):
            w_ih = jax.random.uniform(keys[ki], (4 * H, in_dim), jnp.float32, -k_lstm, k_lstm); ki += 1
            w_hh = jax.random.uniform(keys[ki], (4 * H, H), jnp.float32, -k_lstm, k_lstm); ki += 1
            b_ih = jax.random.uniform(keys[ki], (4 * H,), jnp.float32, -k_lstm, k_lstm); ki += 1
            b_hh = jax.random.uniform(keys[ki], (4 * H,), jnp.float32, -k_lstm, k_lstm); ki += 1
            lstm.append(dict(w_ih=w_ih, w_hh=w_hh, b_ih=b_ih, b_hh=b_hh))
    k_fc = 1.0 / float(np.sqrt(4 * H))
    w_fc = jax.random.uniform(keys[ki], (OUTPUT_SIZE, 4 * H), jnp.float32, -k_fc, k_fc); ki += 1
    b_fc = jax.random.uniform(keys[ki], (OUTPUT_SIZE,), jnp.float32, -k_fc, k_fc)
    return dict(lstm=lstm, w_fc=w_fc, b_fc=b_fc)   # lstm order: [l0_fwd, l0_bwd, l1_fwd, l1_bwd]


def _place_cols(w_t, d):
    """Scatter a transposed per-direction weight (X, 4H) (PyTorch gate cols [i|f|g|o])
    into an (X, G) matrix at the gate-major / direction-minor column layout
    [i_f,i_b | f_f,f_b | g_f,g_b | o_f,o_b] (PyTorch gate order kept)."""
    out = jnp.zeros((w_t.shape[0], G), jnp.float32)
    for q in range(4):
        out = out.at[:, q * DH + d * H:q * DH + (d + 1) * H].set(w_t[:, q * H:(q + 1) * H])
    return out


def prepare_kernel_params(params):
    lstm = params["lstm"]
    bf16 = jnp.bfloat16

    def pad_in(w_ih):                        # (4H, in_dim) -> transposed + zero-padded (IN_PAD, 4H)
        w_t = w_ih.T
        return jnp.zeros((IN_PAD, 4 * H), jnp.float32).at[:w_t.shape[0]].set(w_t)

    # layer-0 packed input->gate weights: columns [0:G]=fwd-dir gate cols, [G:2G]=bwd-dir.
    w0f = _place_cols(pad_in(lstm[0]["w_ih"]), 0)
    w0b = _place_cols(pad_in(lstm[1]["w_ih"]), 1)
    w0 = jnp.concatenate([w0f, w0b], axis=1)                 # (IN_PAD, 2G)

    def whh_fused(p_f, p_b):                 # block-diagonal (DH, G): fwd rows -> fwd cols, bwd -> bwd
        out = jnp.zeros((DH, G), jnp.float32)
        out = out.at[0:H].set(_place_cols(p_f["w_hh"].T, 0))
        out = out.at[H:DH].set(_place_cols(p_b["w_hh"].T, 1))
        return out

    def bias_fused(p_f, p_b):                # disjoint columns -> plain add
        return (_place_cols((p_f["b_ih"] + p_f["b_hh"])[None, :], 0)
                + _place_cols((p_b["b_ih"] + p_b["b_hh"])[None, :], 1))

    whh0, whh1 = whh_fused(lstm[0], lstm[1]), whh_fused(lstm[2], lstm[3])
    b0, b1 = bias_fused(lstm[0], lstm[1]), bias_fused(lstm[2], lstm[3])

    # Layer-1 input weights re-expressed on fused layer-0 states hs0[s] = [h0_fwd(s) | h0_bwd(T-1-s)]:
    #   xp1[s] = hs0[s] @ WA + hs0[T-1-s] @ WB
    wf_cols = _place_cols(lstm[2]["w_ih"].T, 0)          # (2H, G), layer-1 fwd weights, fwd gate cols
    wb_cols = _place_cols(lstm[3]["w_ih"].T, 1)          # (2H, G), layer-1 bwd weights, bwd gate cols
    wa1 = jnp.concatenate([wf_cols[0:H], wb_cols[H:DH]], axis=0)
    wb1 = jnp.concatenate([wb_cols[0:H], wf_cols[H:DH]], axis=0)
    w1 = jnp.concatenate([wa1, wb1], axis=1)             # (DH, 2G)

    # Mid weight blob: [whh0 | wa1 | wb1 | whh1]  -> (DH, 4G) = (64, 1024)
    wmid = jnp.concatenate([whh0, w1, whh1], axis=1)

    wfc = jnp.zeros((4 * H, OUT_PAD), jnp.float32).at[:, :OUTPUT_SIZE].set(params["w_fc"].T)
    bfc = jnp.zeros((1, OUT_PAD), jnp.float32).at[:, :OUTPUT_SIZE].set(params["b_fc"][None, :])

    # Bias blob: [b0 | b1 | bfc] -> (1, 2G + OUT_PAD)
    bias = jnp.concatenate([b0, b1, bfc], axis=1)

    return dict(w0=w0.astype(bf16), wmid=wmid.astype(bf16), wfc=wfc.astype(bf16), bias=bias)


# --------------------------------------------------------------------------------------
# Pure-JAX reference (f32, PyTorch semantics, eval-mode dropout)
# --------------------------------------------------------------------------------------
def reference(x, params):
    T, B, _ = x.shape

    def run(inp, p, reverse):
        w_ih, w_hh = p["w_ih"].T, p["w_hh"].T
        b = (p["b_ih"] + p["b_hh"])[None, :]
        h = jnp.zeros((B, H), jnp.float32)
        c = jnp.zeros((B, H), jnp.float32)
        outs = [None] * T
        times = range(T - 1, -1, -1) if reverse else range(T)
        for t in times:
            gates = inp[t] @ w_ih + h @ w_hh + b
            i = jax.nn.sigmoid(gates[:, :H]); f = jax.nn.sigmoid(gates[:, H:2 * H])
            g = jnp.tanh(gates[:, 2 * H:3 * H]); o = jax.nn.sigmoid(gates[:, 3 * H:])
            c = f * c + i * g
            h = o * jnp.tanh(c)
            outs[t] = h
        return jnp.stack(outs), h

    lstm = params["lstm"]
    out0f, h0f = run(x, lstm[0], False)
    out0r, h0r = run(x, lstm[1], True)
    l1_in = jnp.concatenate([out0f, out0r], axis=-1)       # (T, B, 2H)
    _, h1f = run(l1_in, lstm[2], False)
    _, h1r = run(l1_in, lstm[3], True)
    feat = jnp.concatenate([h0f, h0r, h1f, h1r], axis=-1)  # (B, 4H)
    return feat @ params["w_fc"].T + params["b_fc"][None, :]


if __name__ == "__main__":
    key = jax.random.PRNGKey(0)
    pkey, xkey = jax.random.split(key)
    params = init_params(pkey)
    kparams = prepare_kernel_params(params)

    T, B = 8, 2
    x = jax.random.normal(xkey, (T, B, INPUT_SIZE), jnp.float32)

    out = jax.block_until_ready(seq2seq_attention(x, kparams))
    assert out.shape == (B, OUTPUT_SIZE) and out.dtype == jnp.float32

    ref = reference(x, params)
    np.testing.assert_allclose(np.asarray(out), np.asarray(ref), rtol=2e-2, atol=2e-2)

    print("KERNEL_OK")
</pallas_src>

<mosaic_0001>
module attributes {stable_mosaic.version = 11 : i64} {
  func.func @lstm_fc_kernel(%arg0: memref<16x8xbf16, #tpu.memory_space<vmem>>, %arg1: memref<8x512xbf16, #tpu.memory_space<vmem>>, %arg2: memref<64x1024xbf16, #tpu.memory_space<vmem>>, %arg3: memref<128x1024xbf16, #tpu.memory_space<vmem>>, %arg4: memref<1x1536xf32, #tpu.memory_space<vmem>>, %arg5: memref<2x1024xf32, #tpu.memory_space<vmem>>) attributes {dimension_semantics = [], scalar_prefetch = 0 : i64, scratch_operands = 0 : i64, tpu.core_type = #tpu.core_type<tc>} {
    %c0 = arith.constant 0 : index
    %c0_0 = arith.constant 0 : index
    %0 = vector.load %arg2[%c0, %c0_0] : memref<64x1024xbf16, #tpu.memory_space<vmem>>, vector<64x256xbf16>
    %c0_1 = arith.constant 0 : index
    %c256 = arith.constant 256 : index
    %1 = vector.load %arg2[%c0_1, %c256] : memref<64x1024xbf16, #tpu.memory_space<vmem>>, vector<64x512xbf16>
    %c0_2 = arith.constant 0 : index
    %c768 = arith.constant 768 : index
    %2 = vector.load %arg2[%c0_2, %c768] : memref<64x1024xbf16, #tpu.memory_space<vmem>>, vector<64x256xbf16>
    %c0_3 = arith.constant 0 : index
    %c0_4 = arith.constant 0 : index
    %3 = vector.load %arg4[%c0_3, %c0_4] : memref<1x1536xf32, #tpu.memory_space<vmem>>, vector<1x256xf32>
    %c0_5 = arith.constant 0 : index
    %c256_6 = arith.constant 256 : index
    %4 = vector.load %arg4[%c0_5, %c256_6] : memref<1x1536xf32, #tpu.memory_space<vmem>>, vector<1x256xf32>
    %c0_7 = arith.constant 0 : index
    %c512 = arith.constant 512 : index
    %5 = vector.load %arg4[%c0_7, %c512] : memref<1x1536xf32, #tpu.memory_space<vmem>>, vector<1x1024xf32>
    %c0_8 = arith.constant 0 : index
    %c0_9 = arith.constant 0 : index
    %6 = vector.load %arg0[%c0_8, %c0_9] : memref<16x8xbf16, #tpu.memory_space<vmem>>, vector<16x8xbf16>
    %c0_10 = arith.constant 0 : index
    %c0_11 = arith.constant 0 : index
    %7 = vector.load %arg1[%c0_10, %c0_11] : memref<8x512xbf16, #tpu.memory_space<vmem>>, vector<8x512xbf16>
    %cst = arith.constant dense<0.000000e+00> : vector<16x512xf32>
    %8 = tpu.matmul %6, %7, %cst {dimension_numbers = #tpu.dot_dimension_numbers<[1], [0], [0], [1], [0, 0, 1, 1], [], []>} : vector<16x8xbf16>, vector<8x512xbf16>, vector<16x512xf32> -> vector<16x512xf32>
    %9 = vector.extract_strided_slice %8 {offsets = [0, 0], sizes = [16, 256], strides = [1, 1]} : vector<16x512xf32> to vector<16x256xf32>
    %10 = vector.broadcast %3 : vector<1x256xf32> to vector<16x256xf32>
    %11 = arith.addf %9, %10 : vector<16x256xf32>
    %12 = vector.extract_strided_slice %8 {offsets = [0, 256], sizes = [16, 256], strides = [1, 1]} : vector<16x512xf32> to vector<16x256xf32>
    %cst_12 = arith.constant 0.000000e+00 : f32
    %13 = vector.broadcast %cst_12 : f32 to vector<2x64xf32>
    %cst_13 = arith.constant 0.000000e+00 : f32
    %14 = vector.broadcast %cst_13 : f32 to vector<2x64xf32>
    %15 = vector.extract_strided_slice %11 {offsets = [0, 0], sizes = [2, 256], strides = [1, 1]} : vector<16x256xf32> to vector<2x256xf32>
    %16 = vector.extract_strided_slice %12 {offsets = [14, 0], sizes = [2, 256], strides = [1, 1]} : vector<16x256xf32> to vector<2x256xf32>
    %17 = arith.addf %15, %16 : vector<2x256xf32>
    %18 = arith.truncf %13 : vector<2x64xf32> to vector<2x64xbf16>
    %cst_14 = arith.constant dense<0.000000e+00> : vector<2x256xf32>
    %19 = tpu.matmul %18, %0, %cst_14 {dimension_numbers = #tpu.dot_dimension_numbers<[1], [0], [0], [1], [0, 0, 1, 1], [], []>} : vector<2x64xbf16>, vector<64x256xbf16>, vector<2x256xf32> -> vector<2x256xf32>
    %20 = arith.addf %17, %19 : vector<2x256xf32>
    %21 = vector.extract_strided_slice %20 {offsets = [0, 0], sizes = [2, 128], strides = [1, 1]} : vector<2x256xf32> to vector<2x128xf32>
    %22 = arith.negf %21 : vector<2x128xf32>
    %23 = math.exp %22 : vector<2x128xf32>
    %cst_15 = arith.constant 1.000000e+00 : f32
    %24 = vector.broadcast %cst_15 : f32 to vector<2x128xf32>
    %25 = arith.addf %24, %23 : vector<2x128xf32>
    %26 = arith.divf %24, %25 : vector<2x128xf32>
    %27 = vector.extract_strided_slice %20 {offsets = [0, 128], sizes = [2, 64], strides = [1, 1]} : vector<2x256xf32> to vector<2x64xf32>
    %28 = math.tanh %27 : vector<2x64xf32>
    %29 = vector.extract_strided_slice %26 {offsets = [0, 64], sizes = [2, 64], strides = [1, 1]} : vector<2x128xf32> to vector<2x64xf32>
    %30 = arith.mulf %29, %14 : vector<2x64xf32>
    %31 = vector.extract_strided_slice %26 {offsets = [0, 0], sizes = [2, 64], strides = [1, 1]} : vector<2x128xf32> to vector<2x64xf32>
    %32 = arith.mulf %31, %28 : vector<2x64xf32>
    %33 = arith.addf %30, %32 : vector<2x64xf32>
    %34 = vector.extract_strided_slice %20 {offsets = [0, 192], sizes = [2, 64], strides = [1, 1]} : vector<2x256xf32> to vector<2x64xf32>
    %35 = arith.negf %34 : vector<2x64xf32>
    %36 = math.exp %35 : vector<2x64xf32>
    %cst_16 = arith.constant 1.000000e+00 : f32
    %37 = vector.broadcast %cst_16 : f32 to vector<2x64xf32>
    %38 = arith.addf %37, %36 : vector<2x64xf32>
    %39 = arith.divf %37, %38 : vector<2x64xf32>
    %40 = math.tanh %33 : vector<2x64xf32>
    %41 = arith.mulf %39, %40 : vector<2x64xf32>
    %42 = vector.extract_strided_slice %11 {offsets = [2, 0], sizes = [2, 256], strides = [1, 1]} : vector<16x256xf32> to vector<2x256xf32>
    %43 = vector.extract_strided_slice %12 {offsets = [12, 0], sizes = [2, 256], strides = [1, 1]} : vector<16x256xf32> to vector<2x256xf32>
    %44 = arith.addf %42, %43 : vector<2x256xf32>
    %45 = arith.truncf %41 : vector<2x64xf32> to vector<2x64xbf16>
    %cst_17 = arith.constant dense<0.000000e+00> : vector<2x256xf32>
    %46 = tpu.matmul %45, %0, %cst_17 {dimension_numbers = #tpu.dot_dimension_numbers<[1], [0], [0], [1], [0, 0, 1, 1], [], []>} : vector<2x64xbf16>, vector<64x256xbf16>, vector<2x256xf32> -> vector<2x256xf32>
    %47 = arith.addf %44, %46 : vector<2x256xf32>
    %48 = vector.extract_strided_slice %47 {offsets = [0, 0], sizes = [2, 128], strides = [1, 1]} : vector<2x256xf32> to vector<2x128xf32>
    %49 = arith.negf %48 : vector<2x128xf32>
    %50 = math.exp %49 : vector<2x128xf32>
    %cst_18 = arith.constant 1.000000e+00 : f32
    %51 = vector.broadcast %cst_18 : f32 to vector<2x128xf32>
    %52 = arith.addf %51, %50 : vector<2x128xf32>
    %53 = arith.divf %51, %52 : vector<2x128xf32>
    %54 = vector.extract_strided_slice %47 {offsets = [0, 128], sizes = [2, 64], strides = [1, 1]} : vector<2x256xf32> to vector<2x64xf32>
    %55 = math.tanh %54 : vector<2x64xf32>
    %56 = vector.extract_strided_slice %53 {offsets = [0, 64], sizes = [2, 64], strides = [1, 1]} : vector<2x128xf32> to vector<2x64xf32>
    %57 = arith.mulf %56, %33 : vector<2x64xf32>
    %58 = vector.extract_strided_slice %53 {offsets = [0, 0], sizes = [2, 64], strides = [1, 1]} : vector<2x128xf32> to vector<2x64xf32>
    %59 = arith.mulf %58, %55 : vector<2x64xf32>
    %60 = arith.addf %57, %59 : vector<2x64xf32>
    %61 = vector.extract_strided_slice %47 {offsets = [0, 192], sizes = [2, 64], strides = [1, 1]} : vector<2x256xf32> to vector<2x64xf32>
    %62 = arith.negf %61 : vector<2x64xf32>
    %63 = math.exp %62 : vector<2x64xf32>
    %cst_19 = arith.constant 1.000000e+00 : f32
    %64 = vector.broadcast %cst_19 : f32 to vector<2x64xf32>
    %65 = arith.addf %64, %63 : vector<2x64xf32>
    %66 = arith.divf %64, %65 : vector<2x64xf32>
    %67 = math.tanh %60 : vector<2x64xf32>
    %68 = arith.mulf %66, %67 : vector<2x64xf32>
    %69 = vector.extract_strided_slice %11 {offsets = [4, 0], sizes = [2, 256], strides = [1, 1]} : vector<16x256xf32> to vector<2x256xf32>
    %70 = vector.extract_strided_slice %12 {offsets = [10, 0], sizes = [2, 256], strides = [1, 1]} : vector<16x256xf32> to vector<2x256xf32>
    %71 = arith.addf %69, %70 : vector<2x256xf32>
    %72 = arith.truncf %68 : vector<2x64xf32> to vector<2x64xbf16>
    %cst_20 = arith.constant dense<0.000000e+00> : vector<2x256xf32>
    %73 = tpu.matmul %72, %0, %cst_20 {dimension_numbers = #tpu.dot_dimension_numbers<[1], [0], [0], [1], [0, 0, 1, 1], [], []>} : vector<2x64xbf16>, vector<64x256xbf16>, vector<2x256xf32> -> vector<2x256xf32>
    %74 = arith.addf %71, %73 : vector<2x256xf32>
    %75 = vector.extract_strided_slice %74 {offsets = [0, 0], sizes = [2, 128], strides = [1, 1]} : vector<2x256xf32> to vector<2x128xf32>
    %76 = arith.negf %75 : vector<2x128xf32>
    %77 = math.exp %76 : vector<2x128xf32>
    %cst_21 = arith.constant 1.000000e+00 : f32
    %78 = vector.broadcast %cst_21 : f32 to vector<2x128xf32>
    %79 = arith.addf %78, %77 : vector<2x128xf32>
    %80 = arith.divf %78, %79 : vector<2x128xf32>
    %81 = vector.extract_strided_slice %74 {offsets = [0, 128], sizes = [2, 64], strides = [1, 1]} : vector<2x256xf32> to vector<2x64xf32>
    %82 = math.tanh %81 : vector<2x64xf32>
    %83 = vector.extract_strided_slice %80 {offsets = [0, 64], sizes = [2, 64], strides = [1, 1]} : vector<2x128xf32> to vector<2x64xf32>
    %84 = arith.mulf %83, %60 : vector<2x64xf32>
    %85 = vector.extract_strided_slice %80 {offsets = [0, 0], sizes = [2, 64], strides = [1, 1]} : vector<2x128xf32> to vector<2x64xf32>
    %86 = arith.mulf %85, %82 : vector<2x64xf32>
    %87 = arith.addf %84, %86 : vector<2x64xf32>
    %88 = vector.extract_strided_slice %74 {offsets = [0, 192], sizes = [2, 64], strides = [1, 1]} : vector<2x256xf32> to vector<2x64xf32>
    %89 = arith.negf %88 : vector<2x64xf32>
    %90 = math.exp %89 : vector<2x64xf32>
    %cst_22 = arith.constant 1.000000e+00 : f32
    %91 = vector.broadcast %cst_22 : f32 to vector<2x64xf32>
    %92 = arith.addf %91, %90 : vector<2x64xf32>
    %93 = arith.divf %91, %92 : vector<2x64xf32>
    %94 = math.tanh %87 : vector<2x64xf32>
    %95 = arith.mulf %93, %94 : vector<2x64xf32>
    %96 = vector.extract_strided_slice %11 {offsets = [6, 0], sizes = [2, 256], strides = [1, 1]} : vector<16x256xf32> to vector<2x256xf32>
    %97 = vector.extract_strided_slice %12 {offsets = [8, 0], sizes = [2, 256], strides = [1, 1]} : vector<16x256xf32> to vector<2x256xf32>
    %98 = arith.addf %96, %97 : vector<2x256xf32>
    %99 = arith.truncf %95 : vector<2x64xf32> to vector<2x64xbf16>
    %cst_23 = arith.constant dense<0.000000e+00> : vector<2x256xf32>
    %100 = tpu.matmul %99, %0, %cst_23 {dimension_numbers = #tpu.dot_dimension_numbers<[1], [0], [0], [1], [0, 0, 1, 1], [], []>} : vector<2x64xbf16>, vector<64x256xbf16>, vector<2x256xf32> -> vector<2x256xf32>
    %101 = arith.addf %98, %100 : vector<2x256xf32>
    %102 = vector.extract_strided_slice %101 {offsets = [0, 0], sizes = [2, 128], strides = [1, 1]} : vector<2x256xf32> to vector<2x128xf32>
    %103 = arith.negf %102 : vector<2x128xf32>
    %104 = math.exp %103 : vector<2x128xf32>
    %cst_24 = arith.constant 1.000000e+00 : f32
    %105 = vector.broadcast %cst_24 : f32 to vector<2x128xf32>
    %106 = arith.addf %105, %104 : vector<2x128xf32>
    %107 = arith.divf %105, %106 : vector<2x128xf32>
    %108 = vector.extract_strided_slice %101 {offsets = [0, 128], sizes = [2, 64], strides = [1, 1]} : vector<2x256xf32> to vector<2x64xf32>
    %109 = math.tanh %108 : vector<2x64xf32>
    %110 = vector.extract_strided_slice %107 {offsets = [0, 64], sizes = [2, 64], strides = [1, 1]} : vector<2x128xf32> to vector<2x64xf32>
    %111 = arith.mulf %110, %87 : vector<2x64xf32>
    %112 = vector.extract_strided_slice %107 {offsets = [0, 0], sizes = [2, 64], strides = [1, 1]} : vector<2x128xf32> to vector<2x64xf32>
    %113 = arith.mulf %112, %109 : vector<2x64xf32>
    %114 = arith.addf %111, %113 : vector<2x64xf32>
    %115 = vector.extract_strided_slice %101 {offsets = [0, 192], sizes = [2, 64], strides = [1, 1]} : vector<2x256xf32> to vector<2x64xf32>
    %116 = arith.negf %115 : vector<2x64xf32>
    %117 = math.exp %116 : vector<2x64xf32>
    %cst_25 = arith.constant 1.000000e+00 : f32
    %118 = vector.broadcast %cst_25 : f32 to vector<2x64xf32>
    %119 = arith.addf %118, %117 : vector<2x64xf32>
    %120 = arith.divf %118, %119 : vector<2x64xf32>
    %121 = math.tanh %114 : vector<2x64xf32>
    %122 = arith.mulf %120, %121 : vector<2x64xf32>
    %123 = vector.extract_strided_slice %11 {offsets = [8, 0], sizes = [2, 256], strides = [1, 1]} : vector<16x256xf32> to vector<2x256xf32>
    %124 = vector.extract_strided_slice %12 {offsets = [6, 0], sizes = [2, 256], strides = [1, 1]} : vector<16x256xf32> to vector<2x256xf32>
    %125 = arith.addf %123, %124 : vector<2x256xf32>
    %126 = arith.truncf %122 : vector<2x64xf32> to vector<2x64xbf16>
    %cst_26 = arith.constant dense<0.000000e+00> : vector<2x256xf32>
    %127 = tpu.matmul %126, %0, %cst_26 {dimension_numbers = #tpu.dot_dimension_numbers<[1], [0], [0], [1], [0, 0, 1, 1], [], []>} : vector<2x64xbf16>, vector<64x256xbf16>, vector<2x256xf32> -> vector<2x256xf32>
    %128 = arith.addf %125, %127 : vector<2x256xf32>
    %129 = vector.extract_strided_slice %128 {offsets = [0, 0], sizes = [2, 128], strides = [1, 1]} : vector<2x256xf32> to vector<2x128xf32>
    %130 = arith.negf %129 : vector<2x128xf32>
    %131 = math.exp %130 : vector<2x128xf32>
    %cst_27 = arith.constant 1.000000e+00 : f32
    %132 = vector.broadcast %cst_27 : f32 to vector<2x128xf32>
    %133 = arith.addf %132, %131 : vector<2x128xf32>
    %134 = arith.divf %132, %133 : vector<2x128xf32>
    %135 = vector.extract_strided_slice %128 {offsets = [0, 128], sizes = [2, 64], strides = [1, 1]} : vector<2x256xf32> to vector<2x64xf32>
    %136 = math.tanh %135 : vector<2x64xf32>
    %137 = vector.extract_strided_slice %134 {offsets = [0, 64], sizes = [2, 64], strides = [1, 1]} : vector<2x128xf32> to vector<2x64xf32>
    %138 = arith.mulf %137, %114 : vector<2x64xf32>
    %139 = vector.extract_strided_slice %134 {offsets = [0, 0], sizes = [2, 64], strides = [1, 1]} : vector<2x128xf32> to vector<2x64xf32>
    %140 = arith.mulf %139, %136 : vector<2x64xf32>
    %141 = arith.addf %138, %140 : vector<2x64xf32>
    %142 = vector.extract_strided_slice %128 {offsets = [0, 192], sizes = [2, 64], strides = [1, 1]} : vector<2x256xf32> to vector<2x64xf32>
    %143 = arith.negf %142 : vector<2x64xf32>
    %144 = math.exp %143 : vector<2x64xf32>
    %cst_28 = arith.constant 1.000000e+00 : f32
    %145 = vector.broadcast %cst_28 : f32 to vector<2x64xf32>
    %146 = arith.addf %145, %144 : vector<2x64xf32>
    %147 = arith.divf %145, %146 : vector<2x64xf32>
    %148 = math.tanh %141 : vector<2x64xf32>
    %149 = arith.mulf %147, %148 : vector<2x64xf32>
    %150 = vector.extract_strided_slice %11 {offsets = [10, 0], sizes = [2, 256], strides = [1, 1]} : vector<16x256xf32> to vector<2x256xf32>
    %151 = vector.extract_strided_slice %12 {offsets = [4, 0], sizes = [2, 256], strides = [1, 1]} : vector<16x256xf32> to vector<2x256xf32>
    %152 = arith.addf %150, %151 : vector<2x256xf32>
    %153 = arith.truncf %149 : vector<2x64xf32> to vector<2x64xbf16>
    %cst_29 = arith.constant dense<0.000000e+00> : vector<2x256xf32>
    %154 = tpu.matmul %153, %0, %cst_29 {dimension_numbers = #tpu.dot_dimension_numbers<[1], [0], [0], [1], [0, 0, 1, 1], [], []>} : vector<2x64xbf16>, vector<64x256xbf16>, vector<2x256xf32> -> vector<2x256xf32>
    %155 = arith.addf %152, %154 : vector<2x256xf32>
    %156 = vector.extract_strided_slice %155 {offsets = [0, 0], sizes = [2, 128], strides = [1, 1]} : vector<2x256xf32> to vector<2x128xf32>
    %157 = arith.negf %156 : vector<2x128xf32>
    %158 = math.exp %157 : vector<2x128xf32>
    %cst_30 = arith.constant 1.000000e+00 : f32
    %159 = vector.broadcast %cst_30 : f32 to vector<2x128xf32>
    %160 = arith.addf %159, %158 : vector<2x128xf32>
    %161 = arith.divf %159, %160 : vector<2x128xf32>
    %162 = vector.extract_strided_slice %155 {offsets = [0, 128], sizes = [2, 64], strides = [1, 1]} : vector<2x256xf32> to vector<2x64xf32>
    %163 = math.tanh %162 : vector<2x64xf32>
    %164 = vector.extract_strided_slice %161 {offsets = [0, 64], sizes = [2, 64], strides = [1, 1]} : vector<2x128xf32> to vector<2x64xf32>
    %165 = arith.mulf %164, %141 : vector<2x64xf32>
    %166 = vector.extract_strided_slice %161 {offsets = [0, 0], sizes = [2, 64], strides = [1, 1]} : vector<2x128xf32> to vector<2x64xf32>
    %167 = arith.mulf %166, %163 : vector<2x64xf32>
    %168 = arith.addf %165, %167 : vector<2x64xf32>
    %169 = vector.extract_strided_slice %155 {offsets = [0, 192], sizes = [2, 64], strides = [1, 1]} : vector<2x256xf32> to vector<2x64xf32>
    %170 = arith.negf %169 : vector<2x64xf32>
    %171 = math.exp %170 : vector<2x64xf32>
    %cst_31 = arith.constant 1.000000e+00 : f32
    %172 = vector.broadcast %cst_31 : f32 to vector<2x64xf32>
    %173 = arith.addf %172, %171 : vector<2x64xf32>
    %174 = arith.divf %172, %173 : vector<2x64xf32>
    %175 = math.tanh %168 : vector<2x64xf32>
    %176 = arith.mulf %174, %175 : vector<2x64xf32>
    %177 = vector.extract_strided_slice %11 {offsets = [12, 0], sizes = [2, 256], strides = [1, 1]} : vector<16x256xf32> to vector<2x256xf32>
    %178 = vector.extract_strided_slice %12 {offsets = [2, 0], sizes = [2, 256], strides = [1, 1]} : vector<16x256xf32> to vector<2x256xf32>
    %179 = arith.addf %177, %178 : vector<2x256xf32>
    %180 = arith.truncf %176 : vector<2x64xf32> to vector<2x64xbf16>
    %cst_32 = arith.constant dense<0.000000e+00> : vector<2x256xf32>
    %181 = tpu.matmul %180, %0, %cst_32 {dimension_numbers = #tpu.dot_dimension_numbers<[1], [0], [0], [1], [0, 0, 1, 1], [], []>} : vector<2x64xbf16>, vector<64x256xbf16>, vector<2x256xf32> -> vector<2x256xf32>
    %182 = arith.addf %179, %181 : vector<2x256xf32>
    %183 = vector.extract_strided_slice %182 {offsets = [0, 0], sizes = [2, 128], strides = [1, 1]} : vector<2x256xf32> to vector<2x128xf32>
    %184 = arith.negf %183 : vector<2x128xf32>
    %185 = math.exp %184 : vector<2x128xf32>
    %cst_33 = arith.constant 1.000000e+00 : f32
    %186 = vector.broadcast %cst_33 : f32 to vector<2x128xf32>
    %187 = arith.addf %186, %185 : vector<2x128xf32>
    %188 = arith.divf %186, %187 : vector<2x128xf32>
    %189 = vector.extract_strided_slice %182 {offsets = [0, 128], sizes = [2, 64], strides = [1, 1]} : vector<2x256xf32> to vector<2x64xf32>
    %190 = math.tanh %189 : vector<2x64xf32>
    %191 = vector.extract_strided_slice %188 {offsets = [0, 64], sizes = [2, 64], strides = [1, 1]} : vector<2x128xf32> to vector<2x64xf32>
    %192 = arith.mulf %191, %168 : vector<2x64xf32>
    %193 = vector.extract_strided_slice %188 {offsets = [0, 0], sizes = [2, 64], strides = [1, 1]} : vector<2x128xf32> to vector<2x64xf32>
    %194 = arith.mulf %193, %190 : vector<2x64xf32>
    %195 = arith.addf %192, %194 : vector<2x64xf32>
    %196 = vector.extract_strided_slice %182 {offsets = [0, 192], sizes = [2, 64], strides = [1, 1]} : vector<2x256xf32> to vector<2x64xf32>
    %197 = arith.negf %196 : vector<2x64xf32>
    %198 = math.exp %197 : vector<2x64xf32>
    %cst_34 = arith.constant 1.000000e+00 : f32
    %199 = vector.broadcast %cst_34 : f32 to vector<2x64xf32>
    %200 = arith.addf %199, %198 : vector<2x64xf32>
    %201 = arith.divf %199, %200 : vector<2x64xf32>
    %202 = math.tanh %195 : vector<2x64xf32>
    %203 = arith.mulf %201, %202 : vector<2x64xf32>
    %204 = vector.extract_strided_slice %11 {offsets = [14, 0], sizes = [2, 256], strides = [1, 1]} : vector<16x256xf32> to vector<2x256xf32>
    %205 = vector.extract_strided_slice %12 {offsets = [0, 0], sizes = [2, 256], strides = [1, 1]} : vector<16x256xf32> to vector<2x256xf32>
    %206 = arith.addf %204, %205 : vector<2x256xf32>
    %207 = arith.truncf %203 : vector<2x64xf32> to vector<2x64xbf16>
    %cst_35 = arith.constant dense<0.000000e+00> : vector<2x256xf32>
    %208 = tpu.matmul %207, %0, %cst_35 {dimension_numbers = #tpu.dot_dimension_numbers<[1], [0], [0], [1], [0, 0, 1, 1], [], []>} : vector<2x64xbf16>, vector<64x256xbf16>, vector<2x256xf32> -> vector<2x256xf32>
    %209 = arith.addf %206, %208 : vector<2x256xf32>
    %210 = vector.extract_strided_slice %209 {offsets = [0, 0], sizes = [2, 128], strides = [1, 1]} : vector<2x256xf32> to vector<2x128xf32>
    %211 = arith.negf %210 : vector<2x128xf32>
    %212 = math.exp %211 : vector<2x128xf32>
    %cst_36 = arith.constant 1.000000e+00 : f32
    %213 = vector.broadcast %cst_36 : f32 to vector<2x128xf32>
    %214 = arith.addf %213, %212 : vector<2x128xf32>
    %215 = arith.divf %213, %214 : vector<2x128xf32>
    %216 = vector.extract_strided_slice %209 {offsets = [0, 128], sizes = [2, 64], strides = [1, 1]} : vector<2x256xf32> to vector<2x64xf32>
    %217 = math.tanh %216 : vector<2x64xf32>
    %218 = vector.extract_strided_slice %215 {offsets = [0, 64], sizes = [2, 64], strides = [1, 1]} : vector<2x128xf32> to vector<2x64xf32>
    %219 = arith.mulf %218, %195 : vector<2x64xf32>
    %220 = vector.extract_strided_slice %215 {offsets = [0, 0], sizes = [2, 64], strides = [1, 1]} : vector<2x128xf32> to vector<2x64xf32>
    %221 = arith.mulf %220, %217 : vector<2x64xf32>
    %222 = arith.addf %219, %221 : vector<2x64xf32>
    %223 = vector.extract_strided_slice %209 {offsets = [0, 192], sizes = [2, 64], strides = [1, 1]} : vector<2x256xf32> to vector<2x64xf32>
    %224 = arith.negf %223 : vector<2x64xf32>
    %225 = math.exp %224 : vector<2x64xf32>
    %cst_37 = arith.constant 1.000000e+00 : f32
    %226 = vector.broadcast %cst_37 : f32 to vector<2x64xf32>
    %227 = arith.addf %226, %225 : vector<2x64xf32>
    %228 = arith.divf %226, %227 : vector<2x64xf32>
    %229 = math.tanh %222 : vector<2x64xf32>
    %230 = arith.mulf %228, %229 : vector<2x64xf32>
    %231 = arith.truncf %230 : vector<2x64xf32> to vector<2x64xbf16>
    %c0_38 = arith.constant 0 : index
    %c0_39 = arith.constant 0 : index
    %232 = vector.load %arg3[%c0_38, %c0_39] : memref<128x1024xbf16, #tpu.memory_space<vmem>>, vector<64x1024xbf16>
    %cst_40 = arith.constant dense<0.000000e+00> : vector<2x1024xf32>
    %233 = tpu.matmul %231, %232, %cst_40 {dimension_numbers = #tpu.dot_dimension_numbers<[1], [0], [0], [1], [0, 0, 1, 1], [], []>} : vector<2x64xbf16>, vector<64x1024xbf16>, vector<2x1024xf32> -> vector<2x1024xf32>
    %234 = tpu.concatenate %41, %68, %95, %122, %149, %176, %203, %230 in 0 : vector<2x64xf32>, vector<2x64xf32>, vector<2x64xf32>, vector<2x64xf32>, vector<2x64xf32>, vector<2x64xf32>, vector<2x64xf32>, vector<2x64xf32> -> vector<16x64xf32>
    %235 = arith.truncf %234 : vector<16x64xf32> to vector<16x64xbf16>
    %cst_41 = arith.constant dense<0.000000e+00> : vector<16x512xf32>
    %236 = tpu.matmul %235, %1, %cst_41 {dimension_numbers = #tpu.dot_dimension_numbers<[1], [0], [0], [1], [0, 0, 1, 1], [], []>} : vector<16x64xbf16>, vector<64x512xbf16>, vector<16x512xf32> -> vector<16x512xf32>
    %237 = vector.extract_strided_slice %236 {offsets = [0, 0], sizes = [16, 256], strides = [1, 1]} : vector<16x512xf32> to vector<16x256xf32>
    %238 = vector.broadcast %4 : vector<1x256xf32> to vector<16x256xf32>
    %239 = arith.addf %237, %238 : vector<16x256xf32>
    %240 = vector.extract_strided_slice %236 {offsets = [0, 256], sizes = [16, 256], strides = [1, 1]} : vector<16x512xf32> to vector<16x256xf32>
    %cst_42 = arith.constant 0.000000e+00 : f32
    %241 = vector.broadcast %cst_42 : f32 to vector<2x64xf32>
    %cst_43 = arith.constant 0.000000e+00 : f32
    %242 = vector.broadcast %cst_43 : f32 to vector<2x64xf32>
    %243 = vector.extract_strided_slice %239 {offsets = [0, 0], sizes = [2, 256], strides = [1, 1]} : vector<16x256xf32> to vector<2x256xf32>
    %244 = vector.extract_strided_slice %240 {offsets = [14, 0], sizes = [2, 256], strides = [1, 1]} : vector<16x256xf32> to vector<2x256xf32>
    %245 = arith.addf %243, %244 : vector<2x256xf32>
    %246 = arith.truncf %241 : vector<2x64xf32> to vector<2x64xbf16>
    %cst_44 = arith.constant dense<0.000000e+00> : vector<2x256xf32>
    %247 = tpu.matmul %246, %2, %cst_44 {dimension_numbers = #tpu.dot_dimension_numbers<[1], [0], [0], [1], [0, 0, 1, 1], [], []>} : vector<2x64xbf16>, vector<64x256xbf16>, vector<2x256xf32> -> vector<2x256xf32>
    %248 = arith.addf %245, %247 : vector<2x256xf32>
    %249 = vector.extract_strided_slice %248 {offsets = [0, 0], sizes = [2, 128], strides = [1, 1]} : vector<2x256xf32> to vector<2x128xf32>
    %250 = arith.negf %249 : vector<2x128xf32>
    %251 = math.exp %250 : vector<2x128xf32>
    %cst_45 = arith.constant 1.000000e+00 : f32
    %252 = vector.broadcast %cst_45 : f32 to vector<2x128xf32>
    %253 = arith.addf %252, %251 : vector<2x128xf32>
    %254 = arith.divf %252, %253 : vector<2x128xf32>
    %255 = vector.extract_strided_slice %248 {offsets = [0, 128], sizes = [2, 64], strides = [1, 1]} : vector<2x256xf32> to vector<2x64xf32>
    %256 = math.tanh %255 : vector<2x64xf32>
    %257 = vector.extract_strided_slice %254 {offsets = [0, 64], sizes = [2, 64], strides = [1, 1]} : vector<2x128xf32> to vector<2x64xf32>
    %258 = arith.mulf %257, %242 : vector<2x64xf32>
    %259 = vector.extract_strided_slice %254 {offsets = [0, 0], sizes = [2, 64], strides = [1, 1]} : vector<2x128xf32> to vector<2x64xf32>
    %260 = arith.mulf %259, %256 : vector<2x64xf32>
    %261 = arith.addf %258, %260 : vector<2x64xf32>
    %262 = vector.extract_strided_slice %248 {offsets = [0, 192], sizes = [2, 64], strides = [1, 1]} : vector<2x256xf32> to vector<2x64xf32>
    %263 = arith.negf %262 : vector<2x64xf32>
    %264 = math.exp %263 : vector<2x64xf32>
    %cst_46 = arith.constant 1.000000e+00 : f32
    %265 = vector.broadcast %cst_46 : f32 to vector<2x64xf32>
    %266 = arith.addf %265, %264 : vector<2x64xf32>
    %267 = arith.divf %265, %266 : vector<2x64xf32>
    %268 = math.tanh %261 : vector<2x64xf32>
    %269 = arith.mulf %267, %268 : vector<2x64xf32>
    %270 = vector.extract_strided_slice %239 {offsets = [2, 0], sizes = [2, 256], strides = [1, 1]} : vector<16x256xf32> to vector<2x256xf32>
    %271 = vector.extract_strided_slice %240 {offsets = [12, 0], sizes = [2, 256], strides = [1, 1]} : vector<16x256xf32> to vector<2x256xf32>
    %272 = arith.addf %270, %271 : vector<2x256xf32>
    %273 = arith.truncf %269 : vector<2x64xf32> to vector<2x64xbf16>
    %cst_47 = arith.constant dense<0.000000e+00> : vector<2x256xf32>
    %274 = tpu.matmul %273, %2, %cst_47 {dimension_numbers = #tpu.dot_dimension_numbers<[1], [0], [0], [1], [0, 0, 1, 1], [], []>} : vector<2x64xbf16>, vector<64x256xbf16>, vector<2x256xf32> -> vector<2x256xf32>
    %275 = arith.addf %272, %274 : vector<2x256xf32>
    %276 = vector.extract_strided_slice %275 {offsets = [0, 0], sizes = [2, 128], strides = [1, 1]} : vector<2x256xf32> to vector<2x128xf32>
    %277 = arith.negf %276 : vector<2x128xf32>
    %278 = math.exp %277 : vector<2x128xf32>
    %cst_48 = arith.constant 1.000000e+00 : f32
    %279 = vector.broadcast %cst_48 : f32 to vector<2x128xf32>
    %280 = arith.addf %279, %278 : vector<2x128xf32>
    %281 = arith.divf %279, %280 : vector<2x128xf32>
    %282 = vector.extract_strided_slice %275 {offsets = [0, 128], sizes = [2, 64], strides = [1, 1]} : vector<2x256xf32> to vector<2x64xf32>
    %283 = math.tanh %282 : vector<2x64xf32>
    %284 = vector.extract_strided_slice %281 {offsets = [0, 64], sizes = [2, 64], strides = [1, 1]} : vector<2x128xf32> to vector<2x64xf32>
    %285 = arith.mulf %284, %261 : vector<2x64xf32>
    %286 = vector.extract_strided_slice %281 {offsets = [0, 0], sizes = [2, 64], strides = [1, 1]} : vector<2x128xf32> to vector<2x64xf32>
    %287 = arith.mulf %286, %283 : vector<2x64xf32>
    %288 = arith.addf %285, %287 : vector<2x64xf32>
    %289 = vector.extract_strided_slice %275 {offsets = [0, 192], sizes = [2, 64], strides = [1, 1]} : vector<2x256xf32> to vector<2x64xf32>
    %290 = arith.negf %289 : vector<2x64xf32>
    %291 = math.exp %290 : vector<2x64xf32>
    %cst_49 = arith.constant 1.000000e+00 : f32
    %292 = vector.broadcast %cst_49 : f32 to vector<2x64xf32>
    %293 = arith.addf %292, %291 : vector<2x64xf32>
    %294 = arith.divf %292, %293 : vector<2x64xf32>
    %295 = math.tanh %288 : vector<2x64xf32>
    %296 = arith.mulf %294, %295 : vector<2x64xf32>
    %297 = vector.extract_strided_slice %239 {offsets = [4, 0], sizes = [2, 256], strides = [1, 1]} : vector<16x256xf32> to vector<2x256xf32>
    %298 = vector.extract_strided_slice %240 {offsets = [10, 0], sizes = [2, 256], strides = [1, 1]} : vector<16x256xf32> to vector<2x256xf32>
    %299 = arith.addf %297, %298 : vector<2x256xf32>
    %300 = arith.truncf %296 : vector<2x64xf32> to vector<2x64xbf16>
    %cst_50 = arith.constant dense<0.000000e+00> : vector<2x256xf32>
    %301 = tpu.matmul %300, %2, %cst_50 {dimension_numbers = #tpu.dot_dimension_numbers<[1], [0], [0], [1], [0, 0, 1, 1], [], []>} : vector<2x64xbf16>, vector<64x256xbf16>, vector<2x256xf32> -> vector<2x256xf32>
    %302 = arith.addf %299, %301 : vector<2x256xf32>
    %303 = vector.extract_strided_slice %302 {offsets = [0, 0], sizes = [2, 128], strides = [1, 1]} : vector<2x256xf32> to vector<2x128xf32>
    %304 = arith.negf %303 : vector<2x128xf32>
    %305 = math.exp %304 : vector<2x128xf32>
    %cst_51 = arith.constant 1.000000e+00 : f32
    %306 = vector.broadcast %cst_51 : f32 to vector<2x128xf32>
    %307 = arith.addf %306, %305 : vector<2x128xf32>
    %308 = arith.divf %306, %307 : vector<2x128xf32>
    %309 = vector.extract_strided_slice %302 {offsets = [0, 128], sizes = [2, 64], strides = [1, 1]} : vector<2x256xf32> to vector<2x64xf32>
    %310 = math.tanh %309 : vector<2x64xf32>
    %311 = vector.extract_strided_slice %308 {offsets = [0, 64], sizes = [2, 64], strides = [1, 1]} : vector<2x128xf32> to vector<2x64xf32>
    %312 = arith.mulf %311, %288 : vector<2x64xf32>
    %313 = vector.extract_strided_slice %308 {offsets = [0, 0], sizes = [2, 64], strides = [1, 1]} : vector<2x128xf32> to vector<2x64xf32>
    %314 = arith.mulf %313, %310 : vector<2x64xf32>
    %315 = arith.addf %312, %314 : vector<2x64xf32>
    %316 = vector.extract_strided_slice %302 {offsets = [0, 192], sizes = [2, 64], strides = [1, 1]} : vector<2x256xf32> to vector<2x64xf32>
    %317 = arith.negf %316 : vector<2x64xf32>
    %318 = math.exp %317 : vector<2x64xf32>
    %cst_52 = arith.constant 1.000000e+00 : f32
    %319 = vector.broadcast %cst_52 : f32 to vector<2x64xf32>
    %320 = arith.addf %319, %318 : vector<2x64xf32>
    %321 = arith.divf %319, %320 : vector<2x64xf32>
    %322 = math.tanh %315 : vector<2x64xf32>
    %323 = arith.mulf %321, %322 : vector<2x64xf32>
    %324 = vector.extract_strided_slice %239 {offsets = [6, 0], sizes = [2, 256], strides = [1, 1]} : vector<16x256xf32> to vector<2x256xf32>
    %325 = vector.extract_strided_slice %240 {offsets = [8, 0], sizes = [2, 256], strides = [1, 1]} : vector<16x256xf32> to vector<2x256xf32>
    %326 = arith.addf %324, %325 : vector<2x256xf32>
    %327 = arith.truncf %323 : vector<2x64xf32> to vector<2x64xbf16>
    %cst_53 = arith.constant dense<0.000000e+00> : vector<2x256xf32>
    %328 = tpu.matmul %327, %2, %cst_53 {dimension_numbers = #tpu.dot_dimension_numbers<[1], [0], [0], [1], [0, 0, 1, 1], [], []>} : vector<2x64xbf16>, vector<64x256xbf16>, vector<2x256xf32> -> vector<2x256xf32>
    %329 = arith.addf %326, %328 : vector<2x256xf32>
    %330 = vector.extract_strided_slice %329 {offsets = [0, 0], sizes = [2, 128], strides = [1, 1]} : vector<2x256xf32> to vector<2x128xf32>
    %331 = arith.negf %330 : vector<2x128xf32>
    %332 = math.exp %331 : vector<2x128xf32>
    %cst_54 = arith.constant 1.000000e+00 : f32
    %333 = vector.broadcast %cst_54 : f32 to vector<2x128xf32>
    %334 = arith.addf %333, %332 : vector<2x128xf32>
    %335 = arith.divf %333, %334 : vector<2x128xf32>
    %336 = vector.extract_strided_slice %329 {offsets = [0, 128], sizes = [2, 64], strides = [1, 1]} : vector<2x256xf32> to vector<2x64xf32>
    %337 = math.tanh %336 : vector<2x64xf32>
    %338 = vector.extract_strided_slice %335 {offsets = [0, 64], sizes = [2, 64], strides = [1, 1]} : vector<2x128xf32> to vector<2x64xf32>
    %339 = arith.mulf %338, %315 : vector<2x64xf32>
    %340 = vector.extract_strided_slice %335 {offsets = [0, 0], sizes = [2, 64], strides = [1, 1]} : vector<2x128xf32> to vector<2x64xf32>
    %341 = arith.mulf %340, %337 : vector<2x64xf32>
    %342 = arith.addf %339, %341 : vector<2x64xf32>
    %343 = vector.extract_strided_slice %329 {offsets = [0, 192], sizes = [2, 64], strides = [1, 1]} : vector<2x256xf32> to vector<2x64xf32>
    %344 = arith.negf %343 : vector<2x64xf32>
    %345 = math.exp %344 : vector<2x64xf32>
    %cst_55 = arith.constant 1.000000e+00 : f32
    %346 = vector.broadcast %cst_55 : f32 to vector<2x64xf32>
    %347 = arith.addf %346, %345 : vector<2x64xf32>
    %348 = arith.divf %346, %347 : vector<2x64xf32>
    %349 = math.tanh %342 : vector<2x64xf32>
    %350 = arith.mulf %348, %349 : vector<2x64xf32>
    %351 = vector.extract_strided_slice %239 {offsets = [8, 0], sizes = [2, 256], strides = [1, 1]} : vector<16x256xf32> to vector<2x256xf32>
    %352 = vector.extract_strided_slice %240 {offsets = [6, 0], sizes = [2, 256], strides = [1, 1]} : vector<16x256xf32> to vector<2x256xf32>
    %353 = arith.addf %351, %352 : vector<2x256xf32>
    %354 = arith.truncf %350 : vector<2x64xf32> to vector<2x64xbf16>
    %cst_56 = arith.constant dense<0.000000e+00> : vector<2x256xf32>
    %355 = tpu.matmul %354, %2, %cst_56 {dimension_numbers = #tpu.dot_dimension_numbers<[1], [0], [0], [1], [0, 0, 1, 1], [], []>} : vector<2x64xbf16>, vector<64x256xbf16>, vector<2x256xf32> -> vector<2x256xf32>
    %356 = arith.addf %353, %355 : vector<2x256xf32>
    %357 = vector.extract_strided_slice %356 {offsets = [0, 0], sizes = [2, 128], strides = [1, 1]} : vector<2x256xf32> to vector<2x128xf32>
    %358 = arith.negf %357 : vector<2x128xf32>
    %359 = math.exp %358 : vector<2x128xf32>
    %cst_57 = arith.constant 1.000000e+00 : f32
    %360 = vector.broadcast %cst_57 : f32 to vector<2x128xf32>
    %361 = arith.addf %360, %359 : vector<2x128xf32>
    %362 = arith.divf %360, %361 : vector<2x128xf32>
    %363 = vector.extract_strided_slice %356 {offsets = [0, 128], sizes = [2, 64], strides = [1, 1]} : vector<2x256xf32> to vector<2x64xf32>
    %364 = math.tanh %363 : vector<2x64xf32>
    %365 = vector.extract_strided_slice %362 {offsets = [0, 64], sizes = [2, 64], strides = [1, 1]} : vector<2x128xf32> to vector<2x64xf32>
    %366 = arith.mulf %365, %342 : vector<2x64xf32>
    %367 = vector.extract_strided_slice %362 {offsets = [0, 0], sizes = [2, 64], strides = [1, 1]} : vector<2x128xf32> to vector<2x64xf32>
    %368 = arith.mulf %367, %364 : vector<2x64xf32>
    %369 = arith.addf %366, %368 : vector<2x64xf32>
    %370 = vector.extract_strided_slice %356 {offsets = [0, 192], sizes = [2, 64], strides = [1, 1]} : vector<2x256xf32> to vector<2x64xf32>
    %371 = arith.negf %370 : vector<2x64xf32>
    %372 = math.exp %371 : vector<2x64xf32>
    %cst_58 = arith.constant 1.000000e+00 : f32
    %373 = vector.broadcast %cst_58 : f32 to vector<2x64xf32>
    %374 = arith.addf %373, %372 : vector<2x64xf32>
    %375 = arith.divf %373, %374 : vector<2x64xf32>
    %376 = math.tanh %369 : vector<2x64xf32>
    %377 = arith.mulf %375, %376 : vector<2x64xf32>
    %378 = vector.extract_strided_slice %239 {offsets = [10, 0], sizes = [2, 256], strides = [1, 1]} : vector<16x256xf32> to vector<2x256xf32>
    %379 = vector.extract_strided_slice %240 {offsets = [4, 0], sizes = [2, 256], strides = [1, 1]} : vector<16x256xf32> to vector<2x256xf32>
    %380 = arith.addf %378, %379 : vector<2x256xf32>
    %381 = arith.truncf %377 : vector<2x64xf32> to vector<2x64xbf16>
    %cst_59 = arith.constant dense<0.000000e+00> : vector<2x256xf32>
    %382 = tpu.matmul %381, %2, %cst_59 {dimension_numbers = #tpu.dot_dimension_numbers<[1], [0], [0], [1], [0, 0, 1, 1], [], []>} : vector<2x64xbf16>, vector<64x256xbf16>, vector<2x256xf32> -> vector<2x256xf32>
    %383 = arith.addf %380, %382 : vector<2x256xf32>
    %384 = vector.extract_strided_slice %383 {offsets = [0, 0], sizes = [2, 128], strides = [1, 1]} : vector<2x256xf32> to vector<2x128xf32>
    %385 = arith.negf %384 : vector<2x128xf32>
    %386 = math.exp %385 : vector<2x128xf32>
    %cst_60 = arith.constant 1.000000e+00 : f32
    %387 = vector.broadcast %cst_60 : f32 to vector<2x128xf32>
    %388 = arith.addf %387, %386 : vector<2x128xf32>
    %389 = arith.divf %387, %388 : vector<2x128xf32>
    %390 = vector.extract_strided_slice %383 {offsets = [0, 128], sizes = [2, 64], strides = [1, 1]} : vector<2x256xf32> to vector<2x64xf32>
    %391 = math.tanh %390 : vector<2x64xf32>
    %392 = vector.extract_strided_slice %389 {offsets = [0, 64], sizes = [2, 64], strides = [1, 1]} : vector<2x128xf32> to vector<2x64xf32>
    %393 = arith.mulf %392, %369 : vector<2x64xf32>
    %394 = vector.extract_strided_slice %389 {offsets = [0, 0], sizes = [2, 64], strides = [1, 1]} : vector<2x128xf32> to vector<2x64xf32>
    %395 = arith.mulf %394, %391 : vector<2x64xf32>
    %396 = arith.addf %393, %395 : vector<2x64xf32>
    %397 = vector.extract_strided_slice %383 {offsets = [0, 192], sizes = [2, 64], strides = [1, 1]} : vector<2x256xf32> to vector<2x64xf32>
    %398 = arith.negf %397 : vector<2x64xf32>
    %399 = math.exp %398 : vector<2x64xf32>
    %cst_61 = arith.constant 1.000000e+00 : f32
    %400 = vector.broadcast %cst_61 : f32 to vector<2x64xf32>
    %401 = arith.addf %400, %399 : vector<2x64xf32>
    %402 = arith.divf %400, %401 : vector<2x64xf32>
    %403 = math.tanh %396 : vector<2x64xf32>
    %404 = arith.mulf %402, %403 : vector<2x64xf32>
    %405 = vector.extract_strided_slice %239 {offsets = [12, 0], sizes = [2, 256], strides = [1, 1]} : vector<16x256xf32> to vector<2x256xf32>
    %406 = vector.extract_strided_slice %240 {offsets = [2, 0], sizes = [2, 256], strides = [1, 1]} : vector<16x256xf32> to vector<2x256xf32>
    %407 = arith.addf %405, %406 : vector<2x256xf32>
    %408 = arith.truncf %404 : vector<2x64xf32> to vector<2x64xbf16>
    %cst_62 = arith.constant dense<0.000000e+00> : vector<2x256xf32>
    %409 = tpu.matmul %408, %2, %cst_62 {dimension_numbers = #tpu.dot_dimension_numbers<[1], [0], [0], [1], [0, 0, 1, 1], [], []>} : vector<2x64xbf16>, vector<64x256xbf16>, vector<2x256xf32> -> vector<2x256xf32>
    %410 = arith.addf %407, %409 : vector<2x256xf32>
    %411 = vector.extract_strided_slice %410 {offsets = [0, 0], sizes = [2, 128], strides = [1, 1]} : vector<2x256xf32> to vector<2x128xf32>
    %412 = arith.negf %411 : vector<2x128xf32>
    %413 = math.exp %412 : vector<2x128xf32>
    %cst_63 = arith.constant 1.000000e+00 : f32
    %414 = vector.broadcast %cst_63 : f32 to vector<2x128xf32>
    %415 = arith.addf %414, %413 : vector<2x128xf32>
    %416 = arith.divf %414, %415 : vector<2x128xf32>
    %417 = vector.extract_strided_slice %410 {offsets = [0, 128], sizes = [2, 64], strides = [1, 1]} : vector<2x256xf32> to vector<2x64xf32>
    %418 = math.tanh %417 : vector<2x64xf32>
    %419 = vector.extract_strided_slice %416 {offsets = [0, 64], sizes = [2, 64], strides = [1, 1]} : vector<2x128xf32> to vector<2x64xf32>
    %420 = arith.mulf %419, %396 : vector<2x64xf32>
    %421 = vector.extract_strided_slice %416 {offsets = [0, 0], sizes = [2, 64], strides = [1, 1]} : vector<2x128xf32> to vector<2x64xf32>
    %422 = arith.mulf %421, %418 : vector<2x64xf32>
    %423 = arith.addf %420, %422 : vector<2x64xf32>
    %424 = vector.extract_strided_slice %410 {offsets = [0, 192], sizes = [2, 64], strides = [1, 1]} : vector<2x256xf32> to vector<2x64xf32>
    %425 = arith.negf %424 : vector<2x64xf32>
    %426 = math.exp %425 : vector<2x64xf32>
    %cst_64 = arith.constant 1.000000e+00 : f32
    %427 = vector.broadcast %cst_64 : f32 to vector<2x64xf32>
    %428 = arith.addf %427, %426 : vector<2x64xf32>
    %429 = arith.divf %427, %428 : vector<2x64xf32>
    %430 = math.tanh %423 : vector<2x64xf32>
    %431 = arith.mulf %429, %430 : vector<2x64xf32>
    %432 = vector.extract_strided_slice %239 {offsets = [14, 0], sizes = [2, 256], strides = [1, 1]} : vector<16x256xf32> to vector<2x256xf32>
    %433 = vector.extract_strided_slice %240 {offsets = [0, 0], sizes = [2, 256], strides = [1, 1]} : vector<16x256xf32> to vector<2x256xf32>
    %434 = arith.addf %432, %433 : vector<2x256xf32>
    %435 = arith.truncf %431 : vector<2x64xf32> to vector<2x64xbf16>
    %cst_65 = arith.constant dense<0.000000e+00> : vector<2x256xf32>
    %436 = tpu.matmul %435, %2, %cst_65 {dimension_numbers = #tpu.dot_dimension_numbers<[1], [0], [0], [1], [0, 0, 1, 1], [], []>} : vector<2x64xbf16>, vector<64x256xbf16>, vector<2x256xf32> -> vector<2x256xf32>
    %437 = arith.addf %434, %436 : vector<2x256xf32>
    %438 = vector.extract_strided_slice %437 {offsets = [0, 0], sizes = [2, 128], strides = [1, 1]} : vector<2x256xf32> to vector<2x128xf32>
    %439 = arith.negf %438 : vector<2x128xf32>
    %440 = math.exp %439 : vector<2x128xf32>
    %cst_66 = arith.constant 1.000000e+00 : f32
    %441 = vector.broadcast %cst_66 : f32 to vector<2x128xf32>
    %442 = arith.addf %441, %440 : vector<2x128xf32>
    %443 = arith.divf %441, %442 : vector<2x128xf32>
    %444 = vector.extract_strided_slice %437 {offsets = [0, 128], sizes = [2, 64], strides = [1, 1]} : vector<2x256xf32> to vector<2x64xf32>
    %445 = math.tanh %444 : vector<2x64xf32>
    %446 = vector.extract_strided_slice %443 {offsets = [0, 64], sizes = [2, 64], strides = [1, 1]} : vector<2x128xf32> to vector<2x64xf32>
    %447 = arith.mulf %446, %423 : vector<2x64xf32>
    %448 = vector.extract_strided_slice %443 {offsets = [0, 0], sizes = [2, 64], strides = [1, 1]} : vector<2x128xf32> to vector<2x64xf32>
    %449 = arith.mulf %448, %445 : vector<2x64xf32>
    %450 = arith.addf %447, %449 : vector<2x64xf32>
    %451 = vector.extract_strided_slice %437 {offsets = [0, 192], sizes = [2, 64], strides = [1, 1]} : vector<2x256xf32> to vector<2x64xf32>
    %452 = arith.negf %451 : vector<2x64xf32>
    %453 = math.exp %452 : vector<2x64xf32>
    %cst_67 = arith.constant 1.000000e+00 : f32
    %454 = vector.broadcast %cst_67 : f32 to vector<2x64xf32>
    %455 = arith.addf %454, %453 : vector<2x64xf32>
    %456 = arith.divf %454, %455 : vector<2x64xf32>
    %457 = math.tanh %450 : vector<2x64xf32>
    %458 = arith.mulf %456, %457 : vector<2x64xf32>
    %459 = arith.truncf %458 : vector<2x64xf32> to vector<2x64xbf16>
    %c64 = arith.constant 64 : index
    %c0_68 = arith.constant 0 : index
    %460 = vector.load %arg3[%c64, %c0_68] : memref<128x1024xbf16, #tpu.memory_space<vmem>>, vector<64x1024xbf16>
    %cst_69 = arith.constant dense<0.000000e+00> : vector<2x1024xf32>
    %461 = tpu.matmul %459, %460, %cst_69 {dimension_numbers = #tpu.dot_dimension_numbers<[1], [0], [0], [1], [0, 0, 1, 1], [], []>} : vector<2x64xbf16>, vector<64x1024xbf16>, vector<2x1024xf32> -> vector<2x1024xf32>
    %462 = arith.addf %233, %461 : vector<2x1024xf32>
    %463 = vector.broadcast %5 : vector<1x1024xf32> to vector<2x1024xf32>
    %464 = arith.addf %462, %463 : vector<2x1024xf32>
    %c0_70 = arith.constant 0 : index
    %c0_71 = arith.constant 0 : index
    %465 = vector.load %arg5[%c0_70, %c0_71] : memref<2x1024xf32, #tpu.memory_space<vmem>>, vector<2x1024xf32>
    tpu.vector_store %arg5[%c0_70, %c0_71], %464 {strides = array<i32>} : memref<2x1024xf32, #tpu.memory_space<vmem>>, vector<2x1024xf32>,
    return
  }
}

</mosaic_0001>

<bundles_post_ra>
// kernel: tpu_custom_call.1
= control target key start
LH: loop header
LB: loop body
LE: loop exit
PB: predicated region body
PF: predicated region fallthrough
CT: control target
= control target key end

     0   :  { %10 = vsyncpa [#allocation3], 0  ;;  %s3610_s0 = inlined_call_operand.vmem [shape: bf16[16,8], index: 0, kind: input, shape index: {}]   ;;  %s3611_s1 = inlined_call_operand.hbm [shape: bf16[8,512], index: 1, kind: input, shape index: {}]   ;;  %s3612_s2 = inlined_call_operand.hbm [shape: bf16[64,1024], index: 2, kind: input, shape index: {}]   ;;  %s3613_s3 = inlined_call_operand.hbm [shape: bf16[128,1024], index: 3, kind: input, shape index: {}]   ;;  %s3614_s4 = inlined_call_operand.vmem [shape: f32[1,1536], index: 4, kind: input, shape index: {}]   ;;  %s3615_s5 = inlined_call_operand.hbm [shape: f32[2,1024], index: 5, kind: output, shape index: {}]  }
   0x1   :  { %11 = vsyncpa [#allocation6], 0 }
   0x2   :  { %12 = vsyncpa [#allocation4], 0  ;;  %s3131_s18 = smov [#allocation5]   ;;  %s3037_s22 = scalar_lea.hbm %s3612_s2, 4096 }
   0x3   :  { %s30_s19 = sshll.u32 %s3131_s18, 4  ;;  %p3038_p0 = scmp.ne.s32.totalorder %s3612_s2, %s3037_s22  ;;  %s31_s19 = int_to_ptr.vmem [resolvable:$true] %s30_s19 }
   0x4   :  { %p3041_p1 = scmp.lt.u32.totalorder %s3037_s22, %s3612_s2 }
   0x6   :  { %p3043_p2 = pnand %p3041_p1, %p3038_p0 }
   0x8   :  { %3046 = shalt.err (!%p3043_p2)
}
   0x9   :  { %s3047_s27 = scalar_lea.vmem %s31_s19, 4096  ;;  %p3052_p4 = scmp.lt.s32.totalorder %s31_s19, %s31_s19 }
   0xa   :  { %p3048_p3 = scmp.ne.s32.totalorder %s31_s19, %s3047_s27  ;;  %p3053_p5 = scmp.lt.s32.totalorder %s3047_s27, %s3047_s27 }
   0xc   :  { %p3054_p6 = por %p3053_p5, %p3052_p4 }
   0xe   :  { %p3055_p7 = pnand %p3054_p6, %p3048_p3 }
  0x10   :  { %3058 = shalt.err (!%p3055_p7)
}
  0x11   :  { %s3132_s28 = smov 512   ;;  %s3133_s29 = smov 32  }
  0x12   :  { %36 = dma.hbm_to_vmem [thread:$0]  %s3612_s2, 4096, %s31_s19, [#allocation6], %s3132_s28, %s3132_s28, %s3133_s29  }
  0x13   :  { %s3134_s7 = smov [#allocation2]   ;;  %s3135_s9 = smov [#allocation7]  }
  0x14   :  { %s21_s8 = sshll.u32 %s3134_s7, 4  ;;  %s42_s10 = sshll.u32 %s3135_s9, 4  ;;  %s22_s8 = int_to_ptr.vmem [resolvable:$true] %s21_s8  ;;  %s43_s10 = int_to_ptr.vmem [resolvable:$true] %s42_s10 }
  0x15   :  { %s3059_s13 = scalar_lea.hbm %s3611_s1, 256 }
  0x16   :  { %p3060_p8 = scmp.ne.s32.totalorder %s3611_s1, %s3059_s13  ;;  %p3063_p9 = scmp.lt.u32.totalorder %s3059_s13, %s3611_s1 }
  0x18   :  { %p3065_p10 = pnand %p3063_p9, %p3060_p8 }
  0x1a   :  { %3068 = shalt.err (!%p3065_p10)
}
  0x1b   :  { %s3069_s2 = scalar_lea.vmem %s22_s8, 256  ;;  %p3074_p12 = scmp.lt.s32.totalorder %s22_s8, %s22_s8 }
  0x1c   :  { %p3070_p11 = scmp.ne.s32.totalorder %s22_s8, %s3069_s2  ;;  %p3075_p13 = scmp.lt.s32.totalorder %s3069_s2, %s3069_s2 }
  0x1e   :  { %p3076_p0 = por %p3075_p13, %p3074_p12 }
  0x20   :  { %p3077_p1 = pnand %p3076_p0, %p3070_p11 }
  0x22   :  { %3080 = shalt.err (!%p3077_p1)
}
  0x23   :  { %24 = dma.hbm_to_vmem [thread:$0]  %s3611_s1, 256, %s22_s8, [#allocation3]  }
  0x24   :  { %s3081_s22 = scalar_lea.hbm %s3613_s3, 8192 }
  0x25   :  { %p3082_p2 = scmp.ne.s32.totalorder %s3613_s3, %s3081_s22  ;;  %p3085_p3 = scmp.lt.u32.totalorder %s3081_s22, %s3613_s3 }
  0x27   :  { %p3087_p4 = pnand %p3085_p3, %p3082_p2 }
  0x29   :  { %3090 = shalt.err (!%p3087_p4)
}
  0x2a   :  { %s3091_s27 = scalar_lea.vmem %s43_s10, 8192  ;;  %p3096_p6 = scmp.lt.s32.totalorder %s43_s10, %s43_s10 }
  0x2b   :  { %p3092_p5 = scmp.ne.s32.totalorder %s43_s10, %s3091_s27  ;;  %p3097_p7 = scmp.lt.s32.totalorder %s3091_s27, %s3091_s27 }
  0x2d   :  { %p3098_p8 = por %p3097_p7, %p3096_p6 }
  0x2f   :  { %p3099_p9 = pnand %p3098_p8, %p3092_p5 }
  0x31   :  { %3102 = shalt.err (!%p3099_p9)
}
  0x32   :  { %48 = dma.hbm_to_vmem [thread:$0]  %s3613_s3, 8192, %s43_s10, [#allocation6], %s3132_s28, %s3132_s28, %s3133_s29  }
  0x33   :  { %3125 = dma.done.wait [#allocation3], 256  }
  0x34   :  { %3126 = vsyncadd [#allocation3], 4294967040 }
  0x35   :  { %3127 = dma.done.wait [#allocation6], 12288  }
  0x36   :  { %3128 = vsyncadd [#allocation6], 4294955008  ;;  %v3136_v0 = vmov 0   ;;  %v98_v1 = vld [vmem:[#allocation2] sm:$0xff]  ;;  %vm119_vm0 = vcmask 1043456   ;;  %v99_v2 = vld [vmem:[#allocation2 + $0x8] sm:$0xff]  ;;  %v219_v26 = vlaneseq }
  0x37   :  { %164 = vmatprep.mubr.bf16.mxu0 %v3136_v0  ;;  %207 = vmatprep.mubr.bf16.mxu1 %v3136_v0  ;;  %v2672_v3 = vcombine.high %v98_v1, %v98_v1  ;;  %v2674_v4 = vcombine.high %v99_v2, %v99_v2  ;;  %v2671_v5 = vcombine.low %v98_v1, %v98_v1  ;;  %v61_v7 = vld [vmem:[#allocation5] sm:$0xff]  ;;  %vm115_vm1 = vcmask 64512   ;;  %s3137_s6 = smov 64  }
  0x38   :  { %v2673_v6 = vcombine.low %v99_v2, %v99_v2  ;;  %v62_v8 = vld [vmem:[#allocation5 + $0x20] sm:$0xff]  ;;  %v3267_v27 = vshrl.u32 %v219_v26, 7  ;;  %vm281_vm2 = vcmask 523264   ;;  %vm969_vm3 = vcmask 1041408  }
  0x39   :  { %v63_v9 = vld [vmem:[#allocation5 + $0x40] sm:$0xff]  ;;  %2675 = vmatprep.subr.msk.bf16.mxu0 %vm119_vm0, %v2672_v3  ;;  %2677 = vmatprep.subr.msk.bf16.mxu1 %vm119_vm0, %v2674_v4  ;;  %v121_v11 = vsel %vm119_vm0, %v2671_v5, 0  ;;  %v3221_v14 = vcombine.high %v61_v7, %v62_v8  ;;  %v3223_v15 = vcombine.low %v61_v7, %v62_v8  ;;  %vm972_vm4 = vcmask 1045504  }
  0x3a   :  { %v64_v10 = vld [vmem:[#allocation5 + $0x60] sm:$0xff]  ;;  %v127_v12 = vsel %vm119_vm0, %v2673_v6, 0  ;;  %133 = vmatpush1.bf16.msra.mxu0 %v121_v11  ;;  %v3270_v28 = vsub.s32 0, %v3267_v27  ;;  %v3276_v30 = vsub.s32 1, %v3267_v27 }
  0x3b   :  { %v2844_v13 = vld [vmem:[%s3610_s0] sm:$0xff]   ;;  %176 = vmatpush1.bf16.msra.mxu1 %v127_v12  ;;  %285 = vmatprep.subr.bf16.mxu0 %v3221_v14  ;;  %v3226_v16 = vcombine.high %v63_v9, %v64_v10  ;;  %v3230_v19 = vcombine.low %v63_v9, %v64_v10 }
  0x3c   :  { %363 = vmatprep.subr.bf16.mxu1 %v3221_v14  ;;  %v65_v17 = vld [vmem:[#allocation5 + $0x80] sm:$0xff] }
  0x3d   :  { %v66_v18 = vld [vmem:[#allocation5 + $0xa0] sm:$0xff]  ;;  %2676 = vmatmul.mubr.msk.bf16.vlgmr.msra.gmra.mrb[0].mxu0 %vm115_vm1, %v2844_v13 }
  0x3e   :  { %2678 = vmatmul.mubr.msk.bf16.vlgmr.msra.gmra.mrb[0].mxu1 %vm115_vm1, %v2844_v13  ;;  %286 = vmatpush1.bf16.msra.mxu0 %v3223_v15  ;;  %v3234_v20 = vcombine.high %v65_v17, %v66_v18  ;;  %v67_v21 = vld [vmem:[#allocation5 + $0xc0] sm:$0xff]  ;;  %v3240_v23 = vcombine.low %v65_v17, %v66_v18 }
  0x3f   :  { %317 = vmatprep.mubr.bf16.mxu0 %v3136_v0  ;;  %287 = vmatprep.subr.bf16.mxu0 %v3226_v16  ;;  %v68_v22 = vld [vmem:[#allocation5 + $0xe0] sm:$0xff] }
  0x40   :  { %364 = vmatpush1.bf16.msra.mxu1 %v3223_v15  ;;  %395 = vmatprep.mubr.bf16.mxu1 %v3136_v0  ;;  %v3243_v24 = vcombine.high %v67_v21, %v68_v22  ;;  %v3248_v25 = vcombine.low %v67_v21, %v68_v22  ;;  %v93_v29 = vld [vmem:[%s3614_s4] sm:$0x3] }
  0x41   :  { %365 = vmatprep.subr.bf16.mxu1 %v3226_v16  ;;  %v222_v31 = vrot.slane %v93_v29, %v3270_v28  ;;  %v226_v34 = vrot.slane %v93_v29, %v3276_v30 }
  0x42   :  { %288 = vmatpush1.bf16.msra.mxu0 %v3230_v19 }
  0x43   :  { %289 = vmatprep.subr.bf16.mxu0 %v3234_v20 }
  0x44   :  { %366 = vmatpush1.bf16.msra.mxu1 %v3230_v19 }
  0x45   :  { %367 = vmatprep.subr.bf16.mxu1 %v3234_v20 }
  0x46   :  { %290 = vmatpush1.bf16.msra.mxu0 %v3240_v23 }
  0x47   :  { %291 = vmatprep.subr.bf16.mxu0 %v3243_v24 }
  0x48   :  { %368 = vmatpush1.bf16.msra.mxu1 %v3240_v23 }
  0x49   :  { %369 = vmatprep.subr.bf16.mxu1 %v3243_v24 }
  0x4a   :  { %292 = vmatpush1.bf16.msra.mxu0 %v3248_v25 }
  0x4b   :  { %445 = vmatprep.subr.bf16.mxu0 %v3221_v14 }
  0x4c   :  { %370 = vmatpush1.bf16.msra.mxu1 %v3248_v25 }
  0x4d   :  { %527 = vmatprep.subr.bf16.mxu1 %v3221_v14  ;;  %318 = vmatmul.mubr.bf16.vlgmr.msra.gmra.mrb[4].mxu0 %v3136_v0 }
  0x4e   :  { %446 = vmatpush1.bf16.msra.mxu0 %v3223_v15  ;;  %477 = vmatprep.mubr.bf16.mxu0 %v3136_v0 }
  0x4f   :  { %447 = vmatprep.subr.bf16.mxu0 %v3226_v16 }
  0x52   :  { %448 = vmatpush1.bf16.msra.mxu0 %v3230_v19 }
  0x53   :  { %449 = vmatprep.subr.bf16.mxu0 %v3234_v20 }
  0x56   :  { %450 = vmatpush1.bf16.msra.mxu0 %v3240_v23 }
  0x57   :  { %451 = vmatprep.subr.bf16.mxu0 %v3243_v24 }
  0x5a   :  { %452 = vmatpush1.bf16.msra.mxu0 %v3248_v25 }
  0x5b   :  { %617 = vmatprep.subr.bf16.mxu0 %v3221_v14 }
 0x110   :  { %v166_v32 = vpop.f32.mrb[0].mxu0 }
 0x111   :  { %v209_v33 = vpop.f32.mrb[0].mxu1  ;;  %v229_v35 = vadd.f32 %v222_v31, %v166_v32  ;;  %v168_v38 = vpop.f32.mrb[1].mxu0 }
 0x112   :  { %v603_v36 = vrot.slane %v209_v33, 6  ;;  %v685_v37 = vrot.slane %v209_v33, 2  ;;  %v211_v39 = vpop.f32.mrb[1].mxu1  ;;  %v170_v42 = vpop.f32.mrb[2].mxu0  ;;  %v230_v49 = vadd.f32 %v226_v34, %v168_v38 }
 0x113   :  { %v604_v40 = vrot.slane %v211_v39, 6  ;;  %v686_v41 = vrot.slane %v211_v39, 2  ;;  %v213_v43 = vpop.f32.mrb[2].mxu1  ;;  %v231_v44 = vadd.f32 %v222_v31, %v170_v42  ;;  %v172_v47 = vpop.f32.mrb[3].mxu0 }
 0x114   :  { %v235_v45 = vrot.slane %v213_v43, 6  ;;  %v350_v46 = vrot.slane %v213_v43, 2  ;;  %v215_v48 = vpop.f32.mrb[3].mxu1  ;;  %v232_v50 = vadd.f32 %v226_v34, %v172_v47 }
 0x115   :  { %v236_v51 = vrot.slane %v215_v48, 6  ;;  %v351_v52 = vrot.slane %v215_v48, 2  ;;  %v3280_v53 = vadd.f32 %v685_v37, %v231_v44  ;;  %v3286_v56 = vadd.f32 %v603_v36, %v231_v44 }
 0x116   :  { %v3282_v54 = vadd.f32 %v350_v46, %v229_v35  ;;  %v3284_v55 = vadd.f32 %v235_v45, %v229_v35  ;;  %v3288_v57 = vadd.f32 %v686_v41, %v232_v50  ;;  %v3294_v60 = vadd.f32 %v604_v40, %v232_v50 }
 0x117   :  { %v3290_v58 = vadd.f32 %v351_v52, %v230_v49  ;;  %v3292_v59 = vadd.f32 %v236_v51, %v230_v49 }
 0x120   :  { %v319_v61 = vpop.f32.mrb[4].mxu0 }
 0x121   :  { %v326_v62 = vadd.f32 %v319_v61, %v3284_v55  ;;  %v321_v63 = vpop.f32.mrb[5].mxu0 }
 0x122   :  { %v323_v1 = vpop.f32.mrb[6].mxu0  ;;  %v327_v4 = vadd.f32 %v321_v63, %v3292_v59 }
 0x123   :  { %v2687_v2 = vmul.f32 -1.442695, %v326_v62  ;;  %v324_v3 = vpop.f32.mrb[7].mxu0 }
 0x124   :  { %v2688_v10 = vmul.f32 -1.442695, %v327_v4 }
 0x125   :  { %2845 = vpow2.f32 %v2687_v2 }
 0x126   :  { %2847 = vtanh.f32 %v327_v4 }
 0x12f   :  { %v2846_v5 = vpop.eup %2845 }
 0x130   :  { %v331_v6 = vadd.f32 1.0, %v2846_v5  ;;  %v2848_v7 = vpop.eup %2847 }
 0x132   :  { %2849 = vrcp.f32 %v331_v6 }
 0x133   :  { %2851 = vpow2.f32 %v2688_v10 }
 0x13c   :  { %v2850_v8 = vpop.eup %2849 }
 0x13d   :  { %v336_v9 = vmul.f32 %v2850_v8, %v2848_v7  ;;  %v2852_v11 = vpop.eup %2851  ;;  %v335_v13 = vmul.f32 0.0, %v2850_v8 }
 0x13e   :  { %v345_v12 = vadd.f32 1.0, %v2852_v11 }
 0x13f   :  { %338 = vrot.lane.b32.xlu0 %v336_v9, %s3137_s6 }
 0x140   :  { %2853 = vrcp.f32 %v345_v12 }
 0x14a   :  { %v2854_v21 = vpop.eup %2853 }
 0x1b1   :  { %v339_v17 = vpop.permute.xlu0 %338 }
 0x1b2   :  { %v341_v18 = vadd.f32 %v339_v17, %v335_v13 }
 0x1b4   :  { %2855 = vtanh.f32 %v341_v18  ;;  %v420_v44 = vrot.slane %v341_v18, 6 }
 0x1be   :  { %v2856_v22 = vpop.eup %2855 }
 0x1bf   :  { %v3299_v26 = vmul.f32 %v2856_v22, %v2854_v21 }
 0x1c1   :  { %v356_v29 = vpack.c.bf16 %v3299_v26, %v3299_v26 }
 0x1c3   :  { %358 = vrot.lane.b32.xlu0 %v356_v29, %s3137_s6 }
 0x235   :  { %v359_v31 = vpop.permute.xlu0 %358 }
 0x236   :  { %2689 = vmatmul.mubr.msk.bf16.vlgmr.msra.gmra.mrb[4].mxu1 %vm281_vm2, %v359_v31 }
 0x237   :  { %528 = vmatpush1.bf16.msra.mxu1 %v3223_v15  ;;  %559 = vmatprep.mubr.bf16.mxu1 %v3136_v0 }
 0x238   :  { %529 = vmatprep.subr.bf16.mxu1 %v3226_v16 }
 0x23b   :  { %530 = vmatpush1.bf16.msra.mxu1 %v3230_v19 }
 0x23c   :  { %531 = vmatprep.subr.bf16.mxu1 %v3234_v20 }
 0x23f   :  { %532 = vmatpush1.bf16.msra.mxu1 %v3240_v23 }
 0x240   :  { %533 = vmatprep.subr.bf16.mxu1 %v3243_v24 }
 0x243   :  { %534 = vmatpush1.bf16.msra.mxu1 %v3248_v25 }
 0x244   :  { %698 = vmatprep.subr.bf16.mxu1 %v3221_v14 }
 0x309   :  { %v397_v32 = vpop.f32.mrb[4].mxu1 }
 0x30a   :  { %v406_v33 = vrot.slane %v397_v32, 6  ;;  %v399_v34 = vpop.f32.mrb[5].mxu1 }
 0x30b   :  { %v401_v35 = vpop.f32.mrb[6].mxu1  ;;  %v407_v39 = vrot.slane %v399_v34, 6 }
 0x30c   :  { %v410_v36 = vadd.f32 %v406_v33, %v3282_v54  ;;  %v402_v37 = vpop.f32.mrb[7].mxu1 }
 0x30d   :  { %v411_v40 = vadd.f32 %v407_v39, %v3290_v58 }
 0x30e   :  { %v2690_v38 = vmul.f32 -1.442695, %v410_v36 }
 0x30f   :  { %v2691_v48 = vmul.f32 -1.442695, %v411_v40 }
 0x310   :  { %2857 = vpow2.f32 %v2690_v38 }
 0x311   :  { %2859 = vtanh.f32 %v411_v40 }
 0x31a   :  { %v2858_v41 = vpop.eup %2857 }
 0x31b   :  { %v415_v42 = vadd.f32 1.0, %v2858_v41  ;;  %v2860_v43 = vpop.eup %2859 }
 0x31d   :  { %2861 = vrcp.f32 %v415_v42 }
 0x31e   :  { %2863 = vpow2.f32 %v2691_v48 }
 0x327   :  { %v2862_v45 = vpop.eup %2861 }
 0x328   :  { %v423_v46 = vmul.f32 %v2862_v45, %v2860_v43  ;;  %v422_v47 = vmul.f32 %v2862_v45, %v420_v44  ;;  %v2864_v49 = vpop.eup %2863 }
 0x329   :  { %v432_v50 = vadd.f32 1.0, %v2864_v49 }
 0x32a   :  { %425 = vrot.lane.b32.xlu1 %v423_v46, %s3137_s6 }
 0x32b   :  { %2865 = vrcp.f32 %v432_v50 }
 0x335   :  { %v2866_v61 = vpop.eup %2865 }
 0x39c   :  { %v426_v51 = vpop.permute.xlu1 %425 }
 0x39d   :  { %v428_v52 = vadd.f32 %v426_v51, %v422_v47 }
 0x39f   :  { %2867 = vtanh.f32 %v428_v52  ;;  %v502_v21 = vrot.slane %v428_v52, 6 }
 0x3a9   :  { %v2868_v62 = vpop.eup %2867 }
 0x3aa   :  { %v436_v63 = vmul.f32 %v2868_v62, %v2866_v61 }
 0x3ac   :  { %v437_v1 = vpack.c.bf16 %v436_v63, %v436_v63  ;;  %v970_v38 = vsel %vm969_vm3, %v3299_v26, %v436_v63 }
 0x3ae   :  { %v439_v2 = vrot.slane %v437_v1, 1 }
 0x3b0   :  { %440 = vrot.lane.b32.xlu1 %v439_v2, %s3137_s6 }
 0x422   :  { %v441_v3 = vpop.permute.xlu1 %440 }
 0x423   :  { %2692 = vmatmul.mubr.msk.bf16.vlgmr.msra.gmra.mrb[8].mxu0 %vm281_vm2, %v441_v3 }
 0x424   :  { %618 = vmatpush1.bf16.msra.mxu0 %v3223_v15  ;;  %649 = vmatprep.mubr.bf16.mxu0 %v3136_v0 }
 0x425   :  { %619 = vmatprep.subr.bf16.mxu0 %v3226_v16 }
 0x428   :  { %620 = vmatpush1.bf16.msra.mxu0 %v3230_v19 }
 0x429   :  { %621 = vmatprep.subr.bf16.mxu0 %v3234_v20 }
 0x42c   :  { %622 = vmatpush1.bf16.msra.mxu0 %v3240_v23 }
 0x42d   :  { %623 = vmatprep.subr.bf16.mxu0 %v3243_v24 }
 0x430   :  { %624 = vmatpush1.bf16.msra.mxu0 %v3248_v25 }
 0x431   :  { %780 = vmatprep.subr.bf16.mxu0 %v3221_v14 }
 0x4f6   :  { %v479_v4 = vpop.f32.mrb[8].mxu0 }
 0x4f7   :  { %v488_v5 = vrot.slane %v479_v4, 4  ;;  %v481_v6 = vpop.f32.mrb[9].mxu0 }
 0x4f8   :  { %v483_v7 = vpop.f32.mrb[10].mxu0  ;;  %v489_v11 = vrot.slane %v481_v6, 4 }
 0x4f9   :  { %v492_v8 = vadd.f32 %v488_v5, %v3284_v55  ;;  %v484_v9 = vpop.f32.mrb[11].mxu0 }
 0x4fa   :  { %v493_v12 = vadd.f32 %v489_v11, %v3292_v59 }
 0x4fb   :  { %v2693_v10 = vmul.f32 -1.442695, %v492_v8 }
 0x4fc   :  { %v2694_v32 = vmul.f32 -1.442695, %v493_v12 }
 0x4fd   :  { %2869 = vpow2.f32 %v2693_v10 }
 0x4fe   :  { %2871 = vtanh.f32 %v493_v12 }
 0x507   :  { %v2870_v13 = vpop.eup %2869 }
 0x508   :  { %v497_v17 = vadd.f32 1.0, %v2870_v13  ;;  %v2872_v18 = vpop.eup %2871 }
 0x50a   :  { %2873 = vrcp.f32 %v497_v17 }
 0x50b   :  { %2875 = vpow2.f32 %v2694_v32 }
 0x514   :  { %v2874_v22 = vpop.eup %2873 }
 0x515   :  { %v505_v29 = vmul.f32 %v2874_v22, %v2872_v18  ;;  %v504_v31 = vmul.f32 %v2874_v22, %v502_v21  ;;  %v2876_v55 = vpop.eup %2875 }
 0x516   :  { %v514_v33 = vadd.f32 1.0, %v2876_v55 }
 0x517   :  { %507 = vrot.lane.b32.xlu0 %v505_v29, %s3137_s6 }
 0x518   :  { %2877 = vrcp.f32 %v514_v33 }
 0x522   :  { %v2878_v59 = vpop.eup %2877 }
 0x589   :  { %v508_v34 = vpop.permute.xlu0 %507 }
 0x58a   :  { %v510_v35 = vadd.f32 %v508_v34, %v504_v31 }
 0x58c   :  { %2879 = vtanh.f32 %v510_v35  ;;  %v584_v62 = vrot.slane %v510_v35, 6 }
 0x596   :  { %v2880_v36 = vpop.eup %2879 }
 0x597   :  { %v518_v37 = vmul.f32 %v2880_v36, %v2878_v59 }
 0x599   :  { %v519_v39 = vpack.c.bf16 %v518_v37, %v518_v37  ;;  %v971_v40 = vsel %vm119_vm0, %v970_v38, %v518_v37 }
 0x59b   :  { %v521_v41 = vrot.slane %v519_v39, 2 }
 0x59d   :  { %522 = vrot.lane.b32.xlu1 %v521_v41, %s3137_s6 }
 0x60f   :  { %v523_v42 = vpop.permute.xlu1 %522 }
 0x610   :  { %2695 = vmatmul.mubr.msk.bf16.vlgmr.msra.gmra.mrb[8].mxu1 %vm281_vm2, %v523_v42 }
 0x611   :  { %699 = vmatpush1.bf16.msra.mxu1 %v3223_v15  ;;  %730 = vmatprep.mubr.bf16.mxu1 %v3136_v0 }
 0x612   :  { %700 = vmatprep.subr.bf16.mxu1 %v3226_v16 }
 0x615   :  { %701 = vmatpush1.bf16.msra.mxu1 %v3230_v19 }
 0x616   :  { %702 = vmatprep.subr.bf16.mxu1 %v3234_v20 }
 0x619   :  { %703 = vmatpush1.bf16.msra.mxu1 %v3240_v23 }
 0x61a   :  { %704 = vmatprep.subr.bf16.mxu1 %v3243_v24 }
 0x61d   :  { %705 = vmatpush1.bf16.msra.mxu1 %v3248_v25 }
 0x61e   :  { %862 = vmatprep.subr.bf16.mxu1 %v3221_v14 }
 0x6e3   :  { %v561_v26 = vpop.f32.mrb[8].mxu1 }
 0x6e4   :  { %v570_v43 = vrot.slane %v561_v26, 2  ;;  %v563_v44 = vpop.f32.mrb[9].mxu1 }
 0x6e5   :  { %v565_v45 = vpop.f32.mrb[10].mxu1  ;;  %v571_v49 = vrot.slane %v563_v44, 2 }
 0x6e6   :  { %v574_v46 = vadd.f32 %v570_v43, %v3282_v54  ;;  %v566_v47 = vpop.f32.mrb[11].mxu1 }
 0x6e7   :  { %v575_v50 = vadd.f32 %v571_v49, %v3290_v58 }
 0x6e8   :  { %v2696_v48 = vmul.f32 -1.442695, %v574_v46 }
 0x6e9   :  { %v2697_v2 = vmul.f32 -1.442695, %v575_v50 }
 0x6ea   :  { %2881 = vpow2.f32 %v2696_v48 }
 0x6eb   :  { %2883 = vtanh.f32 %v575_v50 }
 0x6f4   :  { %v2882_v51 = vpop.eup %2881 }
 0x6f5   :  { %v579_v52 = vadd.f32 1.0, %v2882_v51  ;;  %v2884_v61 = vpop.eup %2883 }
 0x6f7   :  { %2885 = vrcp.f32 %v579_v52 }
 0x6f8   :  { %2887 = vpow2.f32 %v2697_v2 }
 0x701   :  { %v2886_v63 = vpop.eup %2885 }
 0x702   :  { %v587_v14 = vmul.f32 %v2886_v63, %v2884_v61  ;;  %v586_v1 = vmul.f32 %v2886_v63, %v584_v62  ;;  %v2888_v54 = vpop.eup %2887 }
 0x703   :  { %v596_v3 = vadd.f32 1.0, %v2888_v54 }
 0x704   :  { %589 = vrot.lane.b32.xlu0 %v587_v14, %s3137_s6 }
 0x705   :  { %2889 = vrcp.f32 %v596_v3 }
 0x70f   :  { %v2890_v58 = vpop.eup %2889 }
 0x776   :  { %v590_v4 = vpop.permute.xlu0 %589 }
 0x777   :  { %v592_v5 = vadd.f32 %v590_v4, %v586_v1 }
 0x779   :  { %2891 = vtanh.f32 %v592_v5  ;;  %v668_v33 = vrot.slane %v592_v5, 6 }
 0x783   :  { %v2892_v6 = vpop.eup %2891 }
 0x784   :  { %v600_v7 = vmul.f32 %v2892_v6, %v2890_v58 }
 0x786   :  { %v609_v8 = vpack.c.bf16 %v600_v7, %v600_v7  ;;  %v3349_v9 = vsel %vm972_vm4, %v971_v40, %v600_v7 }
 0x788   :  { %v611_v10 = vrot.slane %v609_v8, 3 }
 0x78a   :  { %612 = vrot.lane.b32.xlu1 %v611_v10, %s3137_s6 }
 0x7fc   :  { %v613_v11 = vpop.permute.xlu1 %612 }
 0x7fd   :  { %2698 = vmatmul.mubr.msk.bf16.vlgmr.msra.gmra.mrb[12].mxu0 %vm281_vm2, %v613_v11 }
 0x7fe   :  { %781 = vmatpush1.bf16.msra.mxu0 %v3223_v15  ;;  %812 = vmatprep.mubr.bf16.mxu0 %v3136_v0 }
 0x7ff   :  { %782 = vmatprep.subr.bf16.mxu0 %v3226_v16 }
 0x802   :  { %783 = vmatpush1.bf16.msra.mxu0 %v3230_v19 }
 0x803   :  { %784 = vmatprep.subr.bf16.mxu0 %v3234_v20 }
 0x806   :  { %785 = vmatpush1.bf16.msra.mxu0 %v3240_v23 }
 0x807   :  { %786 = vmatprep.subr.bf16.mxu0 %v3243_v24 }
 0x80a   :  { %787 = vmatpush1.bf16.msra.mxu0 %v3248_v25 }
 0x8d0   :  { %v651_v12 = vpop.f32.mrb[12].mxu0 }
 0x8d1   :  { %v658_v13 = vadd.f32 %v651_v12, %v3286_v56  ;;  %v653_v17 = vpop.f32.mrb[13].mxu0 }
 0x8d2   :  { %v655_v18 = vpop.f32.mrb[14].mxu0  ;;  %v659_v29 = vadd.f32 %v653_v17, %v3294_v60 }
 0x8d3   :  { %v2699_v21 = vmul.f32 -1.442695, %v658_v13  ;;  %v656_v22 = vpop.f32.mrb[15].mxu0 }
 0x8d4   :  { %v2700_v36 = vmul.f32 -1.442695, %v659_v29 }
 0x8d5   :  { %2893 = vpow2.f32 %v2699_v21 }
 0x8d6   :  { %2895 = vtanh.f32 %v659_v29 }
 0x8df   :  { %v2894_v31 = vpop.eup %2893 }
 0x8e0   :  { %v663_v32 = vadd.f32 1.0, %v2894_v31  ;;  %v2896_v55 = vpop.eup %2895 }
 0x8e2   :  { %2897 = vrcp.f32 %v663_v32 }
 0x8e3   :  { %2899 = vpow2.f32 %v2700_v36 }
 0x8ec   :  { %v2898_v34 = vpop.eup %2897 }
 0x8ed   :  { %v671_v35 = vmul.f32 %v2898_v34, %v2896_v55  ;;  %v670_v59 = vmul.f32 %v2898_v34, %v668_v33  ;;  %v2900_v37 = vpop.eup %2899 }
 0x8ee   :  { %v680_v38 = vadd.f32 1.0, %v2900_v37 }
 0x8ef   :  { %673 = vrot.lane.b32.xlu0 %v671_v35, %s3137_s6 }
 0x8f0   :  { %2901 = vrcp.f32 %v680_v38 }
 0x8fa   :  { %v2902_v41 = vpop.eup %2901 }
 0x961   :  { %v674_v39 = vpop.permute.xlu0 %673 }
 0x962   :  { %v676_v40 = vadd.f32 %v674_v39, %v670_v59 }
 0x964   :  { %2903 = vtanh.f32 %v676_v40 }
 0x96e   :  { %v2904_v42 = vpop.eup %2903 }
 0x96f   :  { %v3364_v26 = vmul.f32 %v2904_v42, %v2902_v41 }
 0x971   :  { %v691_v43 = vpack.c.bf16 %v3364_v26, %v3364_v26 }
 0x973   :  { %693 = vrot.lane.b32.xlu1 %v691_v43, %s3137_s6 }
 0x9e5   :  { %v694_v44 = vpop.permute.xlu1 %693 }
 0x9e6   :  { %2701 = vmatmul.mubr.msk.bf16.vlgmr.msra.gmra.mrb[12].mxu1 %vm281_vm2, %v694_v44 }
 0x9e7   :  { %863 = vmatpush1.bf16.msra.mxu1 %v3223_v15  ;;  %894 = vmatprep.mubr.bf16.mxu1 %v3136_v0 }
 0x9e8   :  { %864 = vmatprep.subr.bf16.mxu1 %v3226_v16 }
 0x9eb   :  { %865 = vmatpush1.bf16.msra.mxu1 %v3230_v19 }
 0x9ec   :  { %866 = vmatprep.subr.bf16.mxu1 %v3234_v20 }
 0x9ef   :  { %867 = vmatpush1.bf16.msra.mxu1 %v3240_v23 }
 0x9f0   :  { %868 = vmatprep.subr.bf16.mxu1 %v3243_v24  ;;  %v755_v24 = vrot.slane %v676_v40, 6 }
 0x9f3   :  { %869 = vmatpush1.bf16.msra.mxu1 %v3248_v25 }
 0xab9   :  { %v732_v45 = vpop.f32.mrb[12].mxu1 }
 0xaba   :  { %v741_v46 = vrot.slane %v732_v45, 6  ;;  %v734_v47 = vpop.f32.mrb[13].mxu1 }
 0xabb   :  { %v736_v48 = vpop.f32.mrb[14].mxu1  ;;  %v742_v16 = vrot.slane %v734_v47, 6 }
 0xabc   :  { %v745_v15 = vadd.f32 %v741_v46, %v3280_v53  ;;  %v737_v49 = vpop.f32.mrb[15].mxu1 }
 0xabd   :  { %v746_v19 = vadd.f32 %v742_v16, %v3288_v57 }
 0xabe   :  { %v2702_v50 = vmul.f32 -1.442695, %v745_v15 }
 0xabf   :  { %v2703_v62 = vmul.f32 -1.442695, %v746_v19 }
 0xac0   :  { %2905 = vpow2.f32 %v2702_v50 }
 0xac1   :  { %2907 = vtanh.f32 %v746_v19 }
 0xaca   :  { %v2906_v51 = vpop.eup %2905 }
 0xacb   :  { %v750_v20 = vadd.f32 1.0, %v2906_v51  ;;  %v2908_v23 = vpop.eup %2907 }
 0xacd   :  { %2909 = vrcp.f32 %v750_v20 }
 0xace   :  { %2911 = vpow2.f32 %v2703_v62  ;;  %v70_v62 = vld [vmem:[#allocation5 + $0x10] sm:$0xff] }
 0xad7   :  { %v2910_v52 = vpop.eup %2909 }
 0xad8   :  { %v758_v25 = vmul.f32 %v2910_v52, %v2908_v23  ;;  %v757_v61 = vmul.f32 %v2910_v52, %v755_v24  ;;  %v2912_v63 = vpop.eup %2911 }
 0xad9   :  { %v767_v14 = vadd.f32 1.0, %v2912_v63 }
 0xada   :  { %760 = vrot.lane.b32.xlu0 %v758_v25, %s3137_s6 }
 0xadb   :  { %2913 = vrcp.f32 %v767_v14 }
 0xae5   :  { %v2914_v54 = vpop.eup %2913 }
 0xb4c   :  { %v761_v1 = vpop.permute.xlu0 %760 }
 0xb4d   :  { %v763_v2 = vadd.f32 %v761_v1, %v757_v61  ;;  %v71_v61 = vld [vmem:[#allocation5 + $0x28] sm:$0xff]  ;;  %v72_v1 = vld [vmem:[#allocation5 + $0x30] sm:$0xff] }
 0xb4f   :  { %2915 = vtanh.f32 %v763_v2  ;;  %v837_v32 = vrot.slane %v763_v2, 6  ;;  %v75_v2 = vld [vmem:[#allocation5 + $0x68] sm:$0xff] }
 0xb59   :  { %v2916_v3 = vpop.eup %2915 }
 0xb5a   :  { %v771_v4 = vmul.f32 %v2916_v3, %v2914_v54  ;;  %v2712_v54 = vcombine.low %v70_v62, %v72_v1  ;;  %v2713_v3 = vcombine.high %v70_v62, %v72_v1 }
 0xb5c   :  { %v772_v5 = vpack.c.bf16 %v771_v4, %v771_v4  ;;  %v974_v40 = vsel %vm969_vm3, %v3364_v26, %v771_v4  ;;  %1107 = vmatprep.subr.bf16.mxu1 %v2713_v3 }
 0xb5e   :  { %v774_v58 = vrot.slane %v772_v5, 1  ;;  %v74_v5 = vld [vmem:[#allocation5 + $0x50] sm:$0xff] }
 0xb60   :  { %775 = vrot.lane.b32.xlu1 %v774_v58, %s3137_s6  ;;  %v76_v58 = vld [vmem:[#allocation5 + $0x70] sm:$0xff] }
 0xbd2   :  { %v776_v6 = vpop.permute.xlu1 %775 }
 0xbd3   :  { %2704 = vmatmul.mubr.msk.bf16.vlgmr.msra.gmra.mrb[16].mxu0 %vm281_vm2, %v776_v6  ;;  %v77_v6 = vld [vmem:[#allocation5 + $0x88] sm:$0xff] }
 0xbd4   :  { %1096 = vmatprep.mubr.bf16.mxu0 %v3136_v0 }
 0xca6   :  { %v814_v7 = vpop.f32.mrb[16].mxu0 }
 0xca7   :  { %v823_v8 = vrot.slane %v814_v7, 4  ;;  %v816_v10 = vpop.f32.mrb[17].mxu0  ;;  %v2717_v7 = vcombine.high %v74_v5, %v76_v58 }
 0xca8   :  { %v818_v11 = vpop.f32.mrb[18].mxu0  ;;  %v824_v18 = vrot.slane %v816_v10, 4  ;;  %v78_v10 = vld [vmem:[#allocation5 + $0x90] sm:$0xff] }
 0xca9   :  { %v827_v12 = vadd.f32 %v823_v8, %v3286_v56  ;;  %v819_v13 = vpop.f32.mrb[19].mxu0  ;;  %v79_v8 = vld [vmem:[#allocation5 + $0xa8] sm:$0xff]  ;;  %v80_v11 = vld [vmem:[#allocation5 + $0xb0] sm:$0xff] }
 0xcaa   :  { %v828_v21 = vadd.f32 %v824_v18, %v3294_v60  ;;  %v2716_v13 = vcombine.low %v74_v5, %v76_v58  ;;  %v2721_v18 = vcombine.high %v78_v10, %v80_v11 }
 0xcab   :  { %v2705_v17 = vmul.f32 -1.442695, %v827_v12 }
 0xcac   :  { %v2706_v35 = vmul.f32 -1.442695, %v828_v21 }
 0xcad   :  { %2917 = vpow2.f32 %v2705_v17  ;;  %v2719_v17 = vcombine.high %v77_v6, %v79_v8 }
 0xcae   :  { %2919 = vtanh.f32 %v828_v21  ;;  %v81_v21 = vld [vmem:[#allocation5 + $0xc8] sm:$0xff] }
 0xcb7   :  { %v2918_v22 = vpop.eup %2917 }
 0xcb8   :  { %v832_v29 = vadd.f32 1.0, %v2918_v22  ;;  %v2920_v31 = vpop.eup %2919  ;;  %v83_v22 = vld [vmem:[#allocation5 + $0xe8] sm:$0xff] }
 0xcba   :  { %2921 = vrcp.f32 %v832_v29  ;;  %v82_v29 = vld [vmem:[#allocation5 + $0xd0] sm:$0xff] }
 0xcbb   :  { %2923 = vpow2.f32 %v2706_v35  ;;  %v85_v35 = vld [vmem:[#allocation5 + $0x18] sm:$0xff] }
 0xcc4   :  { %v2922_v55 = vpop.eup %2921 }
 0xcc5   :  { %v840_v33 = vmul.f32 %v2922_v55, %v2920_v31  ;;  %v839_v34 = vmul.f32 %v2922_v55, %v837_v32  ;;  %v2924_v56 = vpop.eup %2923  ;;  %v84_v31 = vld [vmem:[#allocation5 + $0xf0] sm:$0xff]  ;;  %v2718_v32 = vcombine.low %v77_v6, %v79_v8  ;;  %v2720_v55 = vcombine.low %v78_v10, %v80_v11 }
 0xcc6   :  { %v849_v59 = vadd.f32 1.0, %v2924_v56  ;;  %v86_v56 = vld [vmem:[#allocation5 + $0x38] sm:$0xff] }
 0xcc7   :  { %842 = vrot.lane.b32.xlu0 %v840_v33, %s3137_s6  ;;  %v2723_v33 = vcombine.high %v81_v21, %v83_v22 }
 0xcc8   :  { %2925 = vrcp.f32 %v849_v59  ;;  %v2722_v59 = vcombine.low %v81_v21, %v83_v22 }
 0xcd2   :  { %v2926_v60 = vpop.eup %2925 }
 0xd39   :  { %v843_v36 = vpop.permute.xlu0 %842 }
 0xd3a   :  { %v845_v37 = vadd.f32 %v843_v36, %v839_v34  ;;  %v2725_v34 = vcombine.high %v82_v29, %v84_v31  ;;  %v2724_v36 = vcombine.low %v82_v29, %v84_v31 }
 0xd3c   :  { %2927 = vtanh.f32 %v845_v37  ;;  %v919_v23 = vrot.slane %v845_v37, 6  ;;  %v3401_v37 = vcombine.high %v85_v35, %v86_v56 }
 0xd46   :  { %v2928_v38 = vpop.eup %2927 }
 0xd47   :  { %v853_v39 = vmul.f32 %v2928_v38, %v2926_v60 }
 0xd49   :  { %v854_v41 = vpack.c.bf16 %v853_v39, %v853_v39  ;;  %v3390_v42 = vsel %vm119_vm0, %v974_v40, %v853_v39 }
 0xd4b   :  { %v856_v43 = vrot.slane %v854_v41, 2 }
 0xd4d   :  { %857 = vrot.lane.b32.xlu1 %v856_v43, %s3137_s6 }
 0xdbf   :  { %v858_v44 = vpop.permute.xlu1 %857 }
 0xdc0   :  { %2707 = vmatmul.mubr.msk.bf16.vlgmr.msra.gmra.mrb[16].mxu1 %vm281_vm2, %v858_v44 }
 0xdc1   :  { %1139 = vmatprep.mubr.bf16.mxu1 %v3136_v0  ;;  %1108 = vmatpush1.bf16.msra.mxu1 %v2712_v54 }
 0xdc2   :  { %1109 = vmatprep.subr.bf16.mxu1 %v2717_v7 }
 0xdc5   :  { %1110 = vmatpush1.bf16.msra.mxu1 %v2716_v13 }
 0xdc6   :  { %1111 = vmatprep.subr.bf16.mxu1 %v2721_v18 }
 0xdc9   :  { %1112 = vmatpush1.bf16.msra.mxu1 %v2720_v55 }
 0xdca   :  { %1113 = vmatprep.subr.bf16.mxu1 %v2725_v34 }
 0xdcd   :  { %1114 = vmatpush1.bf16.msra.mxu1 %v2724_v36 }
 0xdce   :  { %1291 = vmatprep.subr.bf16.mxu1 %v3401_v37 }
 0xe93   :  { %v896_v45 = vpop.f32.mrb[16].mxu1 }
 0xe94   :  { %v905_v46 = vrot.slane %v896_v45, 2  ;;  %v898_v47 = vpop.f32.mrb[17].mxu1 }
 0xe95   :  { %v900_v48 = vpop.f32.mrb[18].mxu1  ;;  %v906_v50 = vrot.slane %v898_v47, 2 }
 0xe96   :  { %v909_v15 = vadd.f32 %v905_v46, %v3280_v53  ;;  %v901_v49 = vpop.f32.mrb[19].mxu1  ;;  %v69_v53 = vld [vmem:[#allocation5 + $0x8] sm:$0xff]  ;;  %v87_v48 = vld [vmem:[#allocation5 + $0x58] sm:$0xff] }
 0xe97   :  { %v3397_v16 = vadd.f32 %v906_v50, %v3288_v57  ;;  %v2710_v63 = vcombine.low %v69_v53, %v71_v61  ;;  %v2711_v14 = vcombine.high %v69_v53, %v71_v61  ;;  %v73_v57 = vld [vmem:[#allocation5 + $0x48] sm:$0xff]  ;;  %v3413_v49 = vcombine.low %v85_v35, %v86_v56 }
 0xe98   :  { %v2708_v26 = vmul.f32 -1.442695, %v909_v15  ;;  %v2715_v4 = vcombine.high %v73_v57, %v75_v2  ;;  %v2714_v12 = vcombine.low %v73_v57, %v75_v2  ;;  %v88_v15 = vld [vmem:[#allocation5 + $0x78] sm:$0xff] }
 0xe99   :  { %1064 = vmatprep.subr.bf16.mxu0 %v2711_v14  ;;  %v2709_v60 = vmul.f32 -1.442695, %v3397_v16 }
 0xe9a   :  { %2929 = vpow2.f32 %v2708_v26  ;;  %1065 = vmatpush1.bf16.msra.mxu0 %v2710_v63  ;;  %v3415_v26 = vcombine.high %v87_v48, %v88_v15 }
 0xe9b   :  { %2931 = vtanh.f32 %v3397_v16  ;;  %1066 = vmatprep.subr.bf16.mxu0 %v2715_v4  ;;  %v89_v16 = vld [vmem:[#allocation5 + $0x98] sm:$0xff] }
 0xe9e   :  { %1067 = vmatpush1.bf16.msra.mxu0 %v2714_v12 }
 0xe9f   :  { %1068 = vmatprep.subr.bf16.mxu0 %v2719_v17 }
 0xea2   :  { %1069 = vmatpush1.bf16.msra.mxu0 %v2718_v32 }
 0xea3   :  { %1070 = vmatprep.subr.bf16.mxu0 %v2723_v33 }
 0xea4   :  { %v2930_v19 = vpop.eup %2929 }
 0xea5   :  { %v914_v51 = vadd.f32 1.0, %v2930_v19  ;;  %v2932_v20 = vpop.eup %2931  ;;  %v90_v19 = vld [vmem:[#allocation5 + $0xb8] sm:$0xff] }
 0xea6   :  { %1071 = vmatpush1.bf16.msra.mxu0 %v2722_v59 }
 0xea7   :  { %2933 = vrcp.f32 %v914_v51  ;;  %1213 = vmatprep.subr.bf16.mxu0 %v3401_v37  ;;  %v91_v51 = vld [vmem:[#allocation5 + $0xd8] sm:$0xff] }
 0xea8   :  { %2935 = vpow2.f32 %v2709_v60 }
 0xeb1   :  { %v2934_v24 = vpop.eup %2933 }
 0xeb2   :  { %v922_v52 = vmul.f32 %v2934_v24, %v2932_v20  ;;  %v921_v25 = vmul.f32 %v2934_v24, %v919_v23  ;;  %v2936_v38 = vpop.eup %2935  ;;  %v92_v20 = vld [vmem:[#allocation5 + $0xf8] sm:$0xff]  ;;  %v3430_v23 = vcombine.low %v89_v16, %v90_v19 }
 0xeb3   :  { %v931_v39 = vadd.f32 1.0, %v2936_v38  ;;  %v3433_v24 = vcombine.high %v91_v51, %v92_v20 }
 0xeb4   :  { %924 = vrot.lane.b32.xlu0 %v922_v52, %s3137_s6  ;;  %v3438_v52 = vcombine.low %v91_v51, %v92_v20 }
 0xeb5   :  { %2937 = vrcp.f32 %v931_v39 }
 0xebf   :  { %v2938_v43 = vpop.eup %2937 }
 0xf26   :  { %v925_v40 = vpop.permute.xlu0 %924 }
 0xf27   :  { %v927_v41 = vadd.f32 %v925_v40, %v921_v25  ;;  %v94_v25 = vld [vmem:[%s3614_s4 + $0x2] sm:$0x3] }
 0xf28   :  { %v1154_v53 = vrot.slane %v94_v25, %v3270_v28  ;;  %v1158_v61 = vrot.slane %v94_v25, %v3276_v30 }
 0xf29   :  { %2939 = vtanh.f32 %v927_v41 }
 0xf33   :  { %v2940_v44 = vpop.eup %2939 }
 0xf34   :  { %v3406_v45 = vmul.f32 %v2940_v44, %v2938_v43 }
 0xf36   :  { %v976_v46 = vsel %vm972_vm4, %v3390_v42, %v3406_v45  ;;  %v3420_v42 = vcombine.low %v87_v48, %v88_v15 }
 0xf37   :  { %v977_v47 = vpack.c.bf16 %v976_v46, %v3349_v9  ;;  %v3424_v9 = vcombine.high %v89_v16, %v90_v19 }
 0xf39   :  { %979 = vrot.lane.b32.xlu1 %v977_v47, %s3137_s6 }
 0xfab   :  { %v980_v50 = vpop.permute.xlu1 %979 }
 0xfac   :  { %2726 = vmatmul.mubr.msk.bf16.vlgmr.msra.gmra.mrb[20].mxu0 %vm281_vm2, %v980_v50  ;;  %2727 = vmatmul.mubr.msk.bf16.vlgmr.msra.gmra.mrb[20].mxu1 %vm281_vm2, %v980_v50 }
 0xfad   :  { %1214 = vmatpush1.bf16.msra.mxu0 %v3413_v49  ;;  %1245 = vmatprep.mubr.bf16.mxu0 %v3136_v0 }
 0xfae   :  { %1215 = vmatprep.subr.bf16.mxu0 %v3415_v26  ;;  %1292 = vmatpush1.bf16.msra.mxu1 %v3413_v49 }
 0xfaf   :  { %1293 = vmatprep.subr.bf16.mxu1 %v3415_v26  ;;  %1323 = vmatprep.mubr.bf16.mxu1 %v3136_v0 }
 0xfb1   :  { %1216 = vmatpush1.bf16.msra.mxu0 %v3420_v42 }
 0xfb2   :  { %1217 = vmatprep.subr.bf16.mxu0 %v3424_v9  ;;  %1294 = vmatpush1.bf16.msra.mxu1 %v3420_v42 }
 0xfb3   :  { %1295 = vmatprep.subr.bf16.mxu1 %v3424_v9 }
 0xfb5   :  { %1218 = vmatpush1.bf16.msra.mxu0 %v3430_v23 }
 0xfb6   :  { %1219 = vmatprep.subr.bf16.mxu0 %v3433_v24  ;;  %1296 = vmatpush1.bf16.msra.mxu1 %v3430_v23 }
 0xfb7   :  { %1297 = vmatprep.subr.bf16.mxu1 %v3433_v24 }
 0xfb9   :  { %1220 = vmatpush1.bf16.msra.mxu0 %v3438_v52 }
 0xfba   :  { %1298 = vmatpush1.bf16.msra.mxu1 %v3438_v52  ;;  %1373 = vmatprep.subr.bf16.mxu0 %v3401_v37 }
 0xfbb   :  { %1455 = vmatprep.subr.bf16.mxu1 %v3401_v37 }
 0xfbc   :  { %1246 = vmatmul.mubr.bf16.vlgmr.msra.gmra.mrb[24].mxu0 %v3136_v0 }
 0xfbd   :  { %1374 = vmatpush1.bf16.msra.mxu0 %v3413_v49  ;;  %1405 = vmatprep.mubr.bf16.mxu0 %v3136_v0 }
 0xfbe   :  { %1375 = vmatprep.subr.bf16.mxu0 %v3415_v26 }
 0xfc1   :  { %1376 = vmatpush1.bf16.msra.mxu0 %v3420_v42 }
 0xfc2   :  { %1377 = vmatprep.subr.bf16.mxu0 %v3424_v9 }
 0xfc5   :  { %1378 = vmatpush1.bf16.msra.mxu0 %v3430_v23 }
 0xfc6   :  { %1379 = vmatprep.subr.bf16.mxu0 %v3433_v24 }
 0xfc9   :  { %1380 = vmatpush1.bf16.msra.mxu0 %v3438_v52 }
 0xfca   :  { %1545 = vmatprep.subr.bf16.mxu0 %v3401_v37 }
0x107f   :  { %v1098_v62 = vpop.f32.mrb[20].mxu0  ;;  %v1141_v63 = vpop.f32.mrb[20].mxu1 }
0x1080   :  { %v1100_v14 = vpop.f32.mrb[21].mxu0  ;;  %v1143_v1 = vpop.f32.mrb[21].mxu1  ;;  %v1161_v57 = vadd.f32 %v1154_v53, %v1098_v62  ;;  %v1531_v2 = vrot.slane %v1141_v63, 6  ;;  %v1613_v54 = vrot.slane %v1141_v63, 2 }
0x1081   :  { %v1162_v3 = vadd.f32 %v1158_v61, %v1100_v14  ;;  %v1102_v4 = vpop.f32.mrb[22].mxu0  ;;  %v1145_v5 = vpop.f32.mrb[22].mxu1  ;;  %v1532_v58 = vrot.slane %v1143_v1, 6  ;;  %v1614_v12 = vrot.slane %v1143_v1, 2 }
0x1082   :  { %v1163_v6 = vadd.f32 %v1154_v53, %v1102_v4  ;;  %v1167_v7 = vrot.slane %v1145_v5, 6  ;;  %v1278_v8 = vrot.slane %v1145_v5, 2  ;;  %v1104_v10 = vpop.f32.mrb[23].mxu0  ;;  %v1147_v11 = vpop.f32.mrb[23].mxu1 }
0x1083   :  { %v1164_v13 = vadd.f32 %v1158_v61, %v1104_v10  ;;  %v1168_v17 = vrot.slane %v1147_v11, 6  ;;  %v1279_v18 = vrot.slane %v1147_v11, 2 }
0x1084   :  { %v3462_v21 = vadd.f32 %v1613_v54, %v1163_v6  ;;  %v3464_v22 = vadd.f32 %v1278_v8, %v1161_v57  ;;  %v3466_v29 = vadd.f32 %v1167_v7, %v1161_v57  ;;  %v3468_v31 = vadd.f32 %v1531_v2, %v1163_v6 }
0x1085   :  { %v3470_v32 = vadd.f32 %v1614_v12, %v1164_v13  ;;  %v3472_v55 = vadd.f32 %v1279_v18, %v1162_v3  ;;  %v3474_v33 = vadd.f32 %v1168_v17, %v1162_v3  ;;  %v3476_v34 = vadd.f32 %v1532_v58, %v1164_v13 }
0x108f   :  { %v1247_v35 = vpop.f32.mrb[24].mxu0 }
0x1090   :  { %v1254_v56 = vadd.f32 %v1247_v35, %v3466_v29  ;;  %v1249_v59 = vpop.f32.mrb[25].mxu0 }
0x1091   :  { %v1251_v36 = vpop.f32.mrb[26].mxu0  ;;  %v1255_v39 = vadd.f32 %v1249_v59, %v3474_v33 }
0x1092   :  { %v2736_v60 = vmul.f32 -1.442695, %v1254_v56  ;;  %v1252_v38 = vpop.f32.mrb[27].mxu0 }
0x1093   :  { %v2737_v47 = vmul.f32 -1.442695, %v1255_v39 }
0x1094   :  { %2941 = vpow2.f32 %v2736_v60 }
0x1095   :  { %2943 = vtanh.f32 %v1255_v39 }
0x109e   :  { %v2942_v40 = vpop.eup %2941 }
0x109f   :  { %v1259_v41 = vadd.f32 1.0, %v2942_v40  ;;  %v2944_v43 = vpop.eup %2943 }
0x10a1   :  { %2945 = vrcp.f32 %v1259_v41 }
0x10a2   :  { %2947 = vpow2.f32 %v2737_v47 }
0x10ab   :  { %v2946_v44 = vpop.eup %2945 }
0x10ac   :  { %v1264_v46 = vmul.f32 %v2946_v44, %v2944_v43  ;;  %v2948_v48 = vpop.eup %2947  ;;  %v1263_v50 = vmul.f32 0.0, %v2946_v44 }
0x10ad   :  { %v1273_v15 = vadd.f32 1.0, %v2948_v48 }
0x10ae   :  { %1266 = vrot.lane.b32.xlu0 %v1264_v46, %s3137_s6 }
0x10af   :  { %2949 = vrcp.f32 %v1273_v15 }
0x10b9   :  { %v2950_v51 = vpop.eup %2949 }
0x1120   :  { %v1267_v16 = vpop.permute.xlu0 %1266 }
0x1121   :  { %v1269_v19 = vadd.f32 %v1267_v16, %v1263_v50 }
0x1123   :  { %2951 = vtanh.f32 %v1269_v19  ;;  %v1348_v7 = vrot.slane %v1269_v19, 6 }
0x112d   :  { %v2952_v20 = vpop.eup %2951 }
0x112e   :  { %v1277_v25 = vmul.f32 %v2952_v20, %v2950_v51 }
0x1130   :  { %v1284_v53 = vpack.c.bf16 %v1277_v25, %v1277_v25 }
0x1132   :  { %1286 = vrot.lane.b32.xlu1 %v1284_v53, %s3137_s6 }
0x11a4   :  { %v1287_v61 = vpop.permute.xlu1 %1286 }
0x11a5   :  { %2738 = vmatmul.mubr.msk.bf16.vlgmr.msra.gmra.mrb[24].mxu1 %vm281_vm2, %v1287_v61 }
0x11a6   :  { %1456 = vmatpush1.bf16.msra.mxu1 %v3413_v49  ;;  %1487 = vmatprep.mubr.bf16.mxu1 %v3136_v0 }
0x11a7   :  { %1457 = vmatprep.subr.bf16.mxu1 %v3415_v26 }
0x11aa   :  { %1458 = vmatpush1.bf16.msra.mxu1 %v3420_v42 }
0x11ab   :  { %1459 = vmatprep.subr.bf16.mxu1 %v3424_v9 }
0x11ae   :  { %1460 = vmatpush1.bf16.msra.mxu1 %v3430_v23 }
0x11af   :  { %1461 = vmatprep.subr.bf16.mxu1 %v3433_v24 }
0x11b2   :  { %1462 = vmatpush1.bf16.msra.mxu1 %v3438_v52 }
0x11b3   :  { %1626 = vmatprep.subr.bf16.mxu1 %v3401_v37 }
0x1278   :  { %v1325_v62 = vpop.f32.mrb[24].mxu1 }
0x1279   :  { %v1334_v63 = vrot.slane %v1325_v62, 6  ;;  %v1327_v14 = vpop.f32.mrb[25].mxu1 }
0x127a   :  { %v1329_v1 = vpop.f32.mrb[26].mxu1  ;;  %v1335_v3 = vrot.slane %v1327_v14, 6 }
0x127b   :  { %v1338_v57 = vadd.f32 %v1334_v63, %v3464_v22  ;;  %v1330_v2 = vpop.f32.mrb[27].mxu1 }
0x127c   :  { %v1339_v4 = vadd.f32 %v1335_v3, %v3472_v55 }
0x127d   :  { %v2739_v54 = vmul.f32 -1.442695, %v1338_v57 }
0x127e   :  { %v2740_v12 = vmul.f32 -1.442695, %v1339_v4 }
0x127f   :  { %2953 = vpow2.f32 %v2739_v54 }
0x1280   :  { %2955 = vtanh.f32 %v1339_v4 }
0x1289   :  { %v2954_v5 = vpop.eup %2953 }
0x128a   :  { %v1343_v58 = vadd.f32 1.0, %v2954_v5  ;;  %v2956_v6 = vpop.eup %2955 }
0x128c   :  { %2957 = vrcp.f32 %v1343_v58 }
0x128d   :  { %2959 = vpow2.f32 %v2740_v12 }
0x1296   :  { %v2958_v8 = vpop.eup %2957 }
0x1297   :  { %v1351_v10 = vmul.f32 %v2958_v8, %v2956_v6  ;;  %v1350_v11 = vmul.f32 %v2958_v8, %v1348_v7  ;;  %v2960_v13 = vpop.eup %2959 }
0x1298   :  { %v1360_v17 = vadd.f32 1.0, %v2960_v13 }
0x1299   :  { %1353 = vrot.lane.b32.xlu0 %v1351_v10, %s3137_s6 }
0x129a   :  { %2961 = vrcp.f32 %v1360_v17 }
0x12a4   :  { %v2962_v56 = vpop.eup %2961 }
0x130b   :  { %v1354_v18 = vpop.permute.xlu0 %1353 }
0x130c   :  { %v1356_v35 = vadd.f32 %v1354_v18, %v1350_v11 }
0x130e   :  { %2963 = vtanh.f32 %v1356_v35  ;;  %v1430_v20 = vrot.slane %v1356_v35, 6 }
0x1318   :  { %v2964_v59 = vpop.eup %2963 }
0x1319   :  { %v1364_v36 = vmul.f32 %v2964_v59, %v2962_v56 }
0x131b   :  { %v1365_v60 = vpack.c.bf16 %v1364_v36, %v1364_v36 }
0x131d   :  { %v1367_v38 = vrot.slane %v1365_v60, 1 }
0x131f   :  { %1368 = vrot.lane.b32.xlu1 %v1367_v38, %s3137_s6 }
0x1391   :  { %v1369_v39 = vpop.permute.xlu1 %1368 }
0x1392   :  { %2741 = vmatmul.mubr.msk.bf16.vlgmr.msra.gmra.mrb[28].mxu0 %vm281_vm2, %v1369_v39 }
0x1393   :  { %1546 = vmatpush1.bf16.msra.mxu0 %v3413_v49  ;;  %1577 = vmatprep.mubr.bf16.mxu0 %v3136_v0 }
0x1394   :  { %1547 = vmatprep.subr.bf16.mxu0 %v3415_v26 }
0x1397   :  { %1548 = vmatpush1.bf16.msra.mxu0 %v3420_v42 }
0x1398   :  { %1549 = vmatprep.subr.bf16.mxu0 %v3424_v9 }
0x139b   :  { %1550 = vmatpush1.bf16.msra.mxu0 %v3430_v23 }
0x139c   :  { %1551 = vmatprep.subr.bf16.mxu0 %v3433_v24 }
0x139f   :  { %1552 = vmatpush1.bf16.msra.mxu0 %v3438_v52 }
0x13a0   :  { %1708 = vmatprep.subr.bf16.mxu0 %v3401_v37 }
0x1465   :  { %v1407_v40 = vpop.f32.mrb[28].mxu0 }
0x1466   :  { %v1416_v41 = vrot.slane %v1407_v40, 4  ;;  %v1409_v43 = vpop.f32.mrb[29].mxu0 }
0x1467   :  { %v1411_v44 = vpop.f32.mrb[30].mxu0  ;;  %v1417_v15 = vrot.slane %v1409_v43, 4 }
0x1468   :  { %v1420_v46 = vadd.f32 %v1416_v41, %v3466_v29  ;;  %v1412_v47 = vpop.f32.mrb[31].mxu0 }
0x1469   :  { %v1421_v50 = vadd.f32 %v1417_v15, %v3474_v33 }
0x146a   :  { %v2742_v48 = vmul.f32 -1.442695, %v1420_v46 }
0x146b   :  { %v2743_v62 = vmul.f32 -1.442695, %v1421_v50 }
0x146c   :  { %2965 = vpow2.f32 %v2742_v48 }
0x146d   :  { %2967 = vtanh.f32 %v1421_v50 }
0x1476   :  { %v2966_v16 = vpop.eup %2965 }
0x1477   :  { %v1425_v19 = vadd.f32 1.0, %v2966_v16  ;;  %v2968_v51 = vpop.eup %2967 }
0x1479   :  { %2969 = vrcp.f32 %v1425_v19 }
0x147a   :  { %2971 = vpow2.f32 %v2743_v62 }
0x1483   :  { %v2970_v25 = vpop.eup %2969 }
0x1484   :  { %v1433_v53 = vmul.f32 %v2970_v25, %v2968_v51  ;;  %v1432_v61 = vmul.f32 %v2970_v25, %v1430_v20  ;;  %v2972_v29 = vpop.eup %2971 }
0x1485   :  { %v1442_v63 = vadd.f32 1.0, %v2972_v29 }
0x1486   :  { %1435 = vrot.lane.b32.xlu0 %v1433_v53, %s3137_s6 }
0x1487   :  { %2973 = vrcp.f32 %v1442_v63 }
0x1491   :  { %v2974_v33 = vpop.eup %2973 }
0x14f8   :  { %v1436_v14 = vpop.permute.xlu0 %1435 }
0x14f9   :  { %v1438_v1 = vadd.f32 %v1436_v14, %v1432_v61 }
0x14fb   :  { %2975 = vtanh.f32 %v1438_v1  ;;  %v1512_v56 = vrot.slane %v1438_v1, 6 }
0x1505   :  { %v2976_v57 = vpop.eup %2975 }
0x1506   :  { %v1446_v2 = vmul.f32 %v2976_v57, %v2974_v33 }
0x1508   :  { %v1447_v54 = vpack.c.bf16 %v1446_v2, %v1446_v2 }
0x150a   :  { %v1449_v3 = vrot.slane %v1447_v54, 2 }
0x150c   :  { %1450 = vrot.lane.b32.xlu1 %v1449_v3, %s3137_s6 }
0x157e   :  { %v1451_v4 = vpop.permute.xlu1 %1450 }
0x157f   :  { %2744 = vmatmul.mubr.msk.bf16.vlgmr.msra.gmra.mrb[28].mxu1 %vm281_vm2, %v1451_v4 }
0x1580   :  { %1627 = vmatpush1.bf16.msra.mxu1 %v3413_v49  ;;  %1658 = vmatprep.mubr.bf16.mxu1 %v3136_v0 }
0x1581   :  { %1628 = vmatprep.subr.bf16.mxu1 %v3415_v26 }
0x1584   :  { %1629 = vmatpush1.bf16.msra.mxu1 %v3420_v42 }
0x1585   :  { %1630 = vmatprep.subr.bf16.mxu1 %v3424_v9 }
0x1588   :  { %1631 = vmatpush1.bf16.msra.mxu1 %v3430_v23 }
0x1589   :  { %1632 = vmatprep.subr.bf16.mxu1 %v3433_v24 }
0x158c   :  { %1633 = vmatpush1.bf16.msra.mxu1 %v3438_v52 }
0x158d   :  { %1790 = vmatprep.subr.bf16.mxu1 %v3401_v37 }
0x1652   :  { %v1489_v5 = vpop.f32.mrb[28].mxu1 }
0x1653   :  { %v1498_v58 = vrot.slane %v1489_v5, 2  ;;  %v1491_v6 = vpop.f32.mrb[29].mxu1 }
0x1654   :  { %v1493_v7 = vpop.f32.mrb[30].mxu1  ;;  %v1499_v12 = vrot.slane %v1491_v6, 2 }
0x1655   :  { %v1502_v8 = vadd.f32 %v1498_v58, %v3464_v22  ;;  %v1494_v10 = vpop.f32.mrb[31].mxu1 }
0x1656   :  { %v1503_v13 = vadd.f32 %v1499_v12, %v3472_v55 }
0x1657   :  { %v2745_v11 = vmul.f32 -1.442695, %v1502_v8 }
0x1658   :  { %v2746_v60 = vmul.f32 -1.442695, %v1503_v13 }
0x1659   :  { %2977 = vpow2.f32 %v2745_v11 }
0x165a   :  { %2979 = vtanh.f32 %v1503_v13 }
0x1663   :  { %v2978_v17 = vpop.eup %2977 }
0x1664   :  { %v1507_v18 = vadd.f32 1.0, %v2978_v17  ;;  %v2980_v35 = vpop.eup %2979 }
0x1666   :  { %2981 = vrcp.f32 %v1507_v18 }
0x1667   :  { %2983 = vpow2.f32 %v2746_v60 }
0x1670   :  { %v2982_v59 = vpop.eup %2981 }
0x1671   :  { %v1515_v37 = vmul.f32 %v2982_v59, %v2980_v35  ;;  %v1514_v36 = vmul.f32 %v2982_v59, %v1512_v56  ;;  %v2984_v22 = vpop.eup %2983 }
0x1672   :  { %v1524_v38 = vadd.f32 1.0, %v2984_v22 }
0x1673   :  { %1517 = vrot.lane.b32.xlu0 %v1515_v37, %s3137_s6 }
0x1674   :  { %2985 = vrcp.f32 %v1524_v38 }
0x167e   :  { %v2986_v55 = vpop.eup %2985 }
0x16e5   :  { %v1518_v39 = vpop.permute.xlu0 %1517 }
0x16e6   :  { %v1520_v40 = vadd.f32 %v1518_v39, %v1514_v36 }
0x16e8   :  { %2987 = vtanh.f32 %v1520_v40  ;;  %v1596_v62 = vrot.slane %v1520_v40, 6 }
0x16f2   :  { %v2988_v41 = vpop.eup %2987 }
0x16f3   :  { %v1528_v43 = vmul.f32 %v2988_v41, %v2986_v55 }
0x16f5   :  { %v1537_v44 = vpack.c.bf16 %v1528_v43, %v1528_v43 }
0x16f7   :  { %v1539_v46 = vrot.slane %v1537_v44, 3 }
0x16f9   :  { %1540 = vrot.lane.b32.xlu1 %v1539_v46, %s3137_s6 }
0x176b   :  { %v1541_v47 = vpop.permute.xlu1 %1540 }
0x176c   :  { %2747 = vmatmul.mubr.msk.bf16.vlgmr.msra.gmra.mrb[32].mxu0 %vm281_vm2, %v1541_v47 }
0x176d   :  { %1709 = vmatpush1.bf16.msra.mxu0 %v3413_v49  ;;  %1740 = vmatprep.mubr.bf16.mxu0 %v3136_v0 }
0x176e   :  { %1710 = vmatprep.subr.bf16.mxu0 %v3415_v26 }
0x1771   :  { %1711 = vmatpush1.bf16.msra.mxu0 %v3420_v42 }
0x1772   :  { %1712 = vmatprep.subr.bf16.mxu0 %v3424_v9 }
0x1775   :  { %1713 = vmatpush1.bf16.msra.mxu0 %v3430_v23 }
0x1776   :  { %1714 = vmatprep.subr.bf16.mxu0 %v3433_v24 }
0x1779   :  { %1715 = vmatpush1.bf16.msra.mxu0 %v3438_v52 }
0x183f   :  { %v1579_v48 = vpop.f32.mrb[32].mxu0 }
0x1840   :  { %v1586_v15 = vadd.f32 %v1579_v48, %v3468_v31  ;;  %v1581_v50 = vpop.f32.mrb[33].mxu0 }
0x1841   :  { %v1583_v16 = vpop.f32.mrb[34].mxu0  ;;  %v1587_v20 = vadd.f32 %v1581_v50, %v3476_v34 }
0x1842   :  { %v2748_v19 = vmul.f32 -1.442695, %v1586_v15  ;;  %v1584_v51 = vpop.f32.mrb[35].mxu0 }
0x1843   :  { %v2749_v1 = vmul.f32 -1.442695, %v1587_v20 }
0x1844   :  { %2989 = vpow2.f32 %v2748_v19 }
0x1845   :  { %2991 = vtanh.f32 %v1587_v20 }
0x184e   :  { %v2990_v25 = vpop.eup %2989 }
0x184f   :  { %v1591_v53 = vadd.f32 1.0, %v2990_v25  ;;  %v2992_v61 = vpop.eup %2991 }
0x1851   :  { %2993 = vrcp.f32 %v1591_v53 }
0x1852   :  { %2995 = vpow2.f32 %v2749_v1 }
0x185b   :  { %v2994_v29 = vpop.eup %2993 }
0x185c   :  { %v1599_v63 = vmul.f32 %v2994_v29, %v2992_v61  ;;  %v1598_v14 = vmul.f32 %v2994_v29, %v1596_v62  ;;  %v2996_v33 = vpop.eup %2995 }
0x185d   :  { %v1608_v57 = vadd.f32 1.0, %v2996_v33 }
0x185e   :  { %1601 = vrot.lane.b32.xlu0 %v1599_v63, %s3137_s6 }
0x185f   :  { %2997 = vrcp.f32 %v1608_v57 }
0x1869   :  { %v2998_v3 = vpop.eup %2997 }
0x18d0   :  { %v1602_v2 = vpop.permute.xlu0 %1601 }
0x18d1   :  { %v1604_v54 = vadd.f32 %v1602_v2, %v1598_v14 }
0x18d3   :  { %2999 = vtanh.f32 %v1604_v54 }
0x18dd   :  { %v3000_v4 = vpop.eup %2999 }
0x18de   :  { %v1612_v5 = vmul.f32 %v3000_v4, %v2998_v3 }
0x18e0   :  { %v1619_v58 = vpack.c.bf16 %v1612_v5, %v1612_v5 }
0x18e2   :  { %1621 = vrot.lane.b32.xlu1 %v1619_v58, %s3137_s6 }
0x1954   :  { %v1622_v6 = vpop.permute.xlu1 %1621 }
0x1955   :  { %2750 = vmatmul.mubr.msk.bf16.vlgmr.msra.gmra.mrb[32].mxu1 %vm281_vm2, %v1622_v6 }
0x1956   :  { %1791 = vmatpush1.bf16.msra.mxu1 %v3413_v49  ;;  %1822 = vmatprep.mubr.bf16.mxu1 %v3136_v0 }
0x1957   :  { %1792 = vmatprep.subr.bf16.mxu1 %v3415_v26 }
0x195a   :  { %1793 = vmatpush1.bf16.msra.mxu1 %v3420_v42 }
0x195b   :  { %1794 = vmatprep.subr.bf16.mxu1 %v3424_v9 }
0x195e   :  { %1795 = vmatpush1.bf16.msra.mxu1 %v3430_v23 }
0x195f   :  { %1796 = vmatprep.subr.bf16.mxu1 %v3433_v24  ;;  %v1683_v24 = vrot.slane %v1604_v54, 6 }
0x1962   :  { %1797 = vmatpush1.bf16.msra.mxu1 %v3438_v52 }
0x1a28   :  { %v1660_v7 = vpop.f32.mrb[32].mxu1 }
0x1a29   :  { %v1669_v8 = vrot.slane %v1660_v7, 6  ;;  %v1662_v10 = vpop.f32.mrb[33].mxu1 }
0x1a2a   :  { %v1664_v11 = vpop.f32.mrb[34].mxu1  ;;  %v1670_v26 = vrot.slane %v1662_v10, 6 }
0x1a2b   :  { %v1673_v49 = vadd.f32 %v1669_v8, %v3462_v21  ;;  %v1665_v12 = vpop.f32.mrb[35].mxu1 }
0x1a2c   :  { %v1674_v42 = vadd.f32 %v1670_v26, %v3470_v32 }
0x1a2d   :  { %v2751_v13 = vmul.f32 -1.442695, %v1673_v49 }
0x1a2e   :  { %v2752_v56 = vmul.f32 -1.442695, %v1674_v42 }
0x1a2f   :  { %3001 = vpow2.f32 %v2751_v13 }
0x1a30   :  { %3003 = vtanh.f32 %v1674_v42 }
0x1a39   :  { %v3002_v17 = vpop.eup %3001 }
0x1a3a   :  { %v1678_v9 = vadd.f32 1.0, %v3002_v17  ;;  %v3004_v23 = vpop.eup %3003 }
0x1a3c   :  { %3005 = vrcp.f32 %v1678_v9 }
0x1a3d   :  { %3007 = vpow2.f32 %v2752_v56 }
0x1a46   :  { %v3006_v18 = vpop.eup %3005 }
0x1a47   :  { %v1686_v52 = vmul.f32 %v3006_v18, %v3004_v23  ;;  %v1685_v35 = vmul.f32 %v3006_v18, %v1683_v24  ;;  %v3008_v59 = vpop.eup %3007  ;;  %v936_v24 = vpack.c.bf16 %v3406_v45, %v3406_v45  ;;  %v1878_v45 = vld [vmem:[#allocation7 + $0x168] sm:$0xff] }
0x1a48   :  { %v1695_v37 = vadd.f32 1.0, %v3008_v59 }
0x1a49   :  { %1688 = vrot.lane.b32.xlu0 %v1686_v52, %s3137_s6  ;;  %v2229_v18 = vrot.slane %v936_v24, 3  ;;  %v1869_v52 = vld [vmem:[#allocation7 + $0x120] sm:$0xff] }
0x1a4a   :  { %3009 = vrcp.f32 %v1695_v37  ;;  %v1870_v37 = vld [vmem:[#allocation7 + $0x128] sm:$0xff] }
0x1a54   :  { %v3010_v22 = vpop.eup %3009 }
0x1abb   :  { %v1689_v36 = vpop.permute.xlu0 %1688 }
0x1abc   :  { %v1691_v60 = vadd.f32 %v1689_v36, %v1685_v35  ;;  %v1866_v35 = vld [vmem:[#allocation7 + $0x108] sm:$0xff]  ;;  %v1873_v36 = vld [vmem:[#allocation7 + $0x140] sm:$0xff] }
0x1abe   :  { %3011 = vtanh.f32 %v1691_v60  ;;  %v1765_v53 = vrot.slane %v1691_v60, 6  ;;  %v1877_v60 = vld [vmem:[#allocation7 + $0x160] sm:$0xff] }
0x1ac8   :  { %v3012_v38 = vpop.eup %3011 }
0x1ac9   :  { %v1699_v39 = vmul.f32 %v3012_v38, %v3010_v22  ;;  %v2761_v22 = vcombine.low %v1866_v35, %v1870_v37  ;;  %v2762_v38 = vcombine.high %v1866_v35, %v1870_v37  ;;  %v1891_v37 = vld [vmem:[#allocation7 + $0x1d0] sm:$0xff] }
0x1acb   :  { %v1700_v40 = vpack.c.bf16 %v1699_v39, %v1699_v39  ;;  %v2768_v39 = vcombine.high %v1873_v36, %v1877_v60  ;;  %2105 = vmatprep.subr.bf16.mxu1 %v2762_v38 }
0x1acd   :  { %v1702_v55 = vrot.slane %v1700_v40, 1  ;;  %v1874_v40 = vld [vmem:[#allocation7 + $0x148] sm:$0xff] }
0x1acf   :  { %1703 = vrot.lane.b32.xlu1 %v1702_v55, %s3137_s6  ;;  %v1881_v55 = vld [vmem:[#allocation7 + $0x180] sm:$0xff] }
0x1b41   :  { %v1704_v41 = vpop.permute.xlu1 %1703 }
0x1b42   :  { %2753 = vmatmul.mubr.msk.bf16.vlgmr.msra.gmra.mrb[36].mxu0 %vm281_vm2, %v1704_v41  ;;  %v2770_v41 = vcombine.high %v1874_v40, %v1878_v45 }
0x1b43   :  { %2096 = vmatprep.mubr.bf16.mxu0 %v3136_v0 }
0x1c15   :  { %v1742_v43 = vpop.f32.mrb[36].mxu0 }
0x1c16   :  { %v1751_v44 = vrot.slane %v1742_v43, 4  ;;  %v1744_v46 = vpop.f32.mrb[37].mxu0  ;;  %v1885_v43 = vld [vmem:[#allocation7 + $0x1a0] sm:$0xff] }
0x1c17   :  { %v1746_v47 = vpop.f32.mrb[38].mxu0  ;;  %v1752_v16 = vrot.slane %v1744_v46, 4  ;;  %v1886_v46 = vld [vmem:[#allocation7 + $0x1a8] sm:$0xff] }
0x1c18   :  { %v1755_v48 = vadd.f32 %v1751_v44, %v3468_v31  ;;  %v1747_v15 = vpop.f32.mrb[39].mxu0  ;;  %v1882_v44 = vld [vmem:[#allocation7 + $0x188] sm:$0xff]  ;;  %v2767_v47 = vcombine.low %v1873_v36, %v1877_v60  ;;  %v1895_v36 = vld [vmem:[#allocation7 + $0x1f0] sm:$0xff]  ;;  %v1892_v60 = vld [vmem:[#allocation7 + $0x1d8] sm:$0xff] }
0x1c19   :  { %v1756_v19 = vadd.f32 %v1752_v16, %v3476_v34  ;;  %v2776_v15 = vcombine.high %v1881_v55, %v1885_v43  ;;  %v1867_v16 = vld [vmem:[#allocation7 + $0x110] sm:$0xff] }
0x1c1a   :  { %v2754_v50 = vmul.f32 -1.442695, %v1755_v48  ;;  %v2769_v48 = vcombine.low %v1874_v40, %v1878_v45  ;;  %v2788_v40 = vcombine.high %v1891_v37, %v1895_v36 }
0x1c1b   :  { %v2755_v63 = vmul.f32 -1.442695, %v1756_v19 }
0x1c1c   :  { %3013 = vpow2.f32 %v2754_v50  ;;  %v1889_v50 = vld [vmem:[#allocation7 + $0x1c0] sm:$0xff] }
0x1c1d   :  { %3015 = vtanh.f32 %v1756_v19  ;;  %v1871_v19 = vld [vmem:[#allocation7 + $0x130] sm:$0xff] }
0x1c26   :  { %v3014_v51 = vpop.eup %3013 }
0x1c27   :  { %v1760_v20 = vadd.f32 1.0, %v3014_v51  ;;  %v3016_v25 = vpop.eup %3015  ;;  %v2778_v51 = vcombine.high %v1882_v44, %v1886_v46 }
0x1c29   :  { %3017 = vrcp.f32 %v1760_v20  ;;  %v1893_v20 = vld [vmem:[#allocation7 + $0x1e0] sm:$0xff] }
0x1c2a   :  { %3019 = vpow2.f32 %v2755_v63 }
0x1c33   :  { %v3018_v61 = vpop.eup %3017 }
0x1c34   :  { %v1768_v62 = vmul.f32 %v3018_v61, %v3016_v25  ;;  %v1767_v29 = vmul.f32 %v3018_v61, %v1765_v53  ;;  %v3020_v31 = vpop.eup %3019  ;;  %v2763_v25 = vcombine.low %v1867_v16, %v1871_v19  ;;  %v1868_v53 = vld [vmem:[#allocation7 + $0x118] sm:$0xff] }
0x1c35   :  { %v1777_v14 = vadd.f32 1.0, %v3020_v31  ;;  %v1872_v61 = vld [vmem:[#allocation7 + $0x138] sm:$0xff]  ;;  %v2775_v31 = vcombine.low %v1881_v55, %v1885_v43  ;;  %v937_v55 = vld [vmem:[#allocation7] sm:$0xff]  ;;  %v938_v43 = vld [vmem:[#allocation7 + $0x8] sm:$0xff] }
0x1c36   :  { %1770 = vrot.lane.b32.xlu0 %v1768_v62, %s3137_s6  ;;  %v1890_v62 = vld [vmem:[#allocation7 + $0x1c8] sm:$0xff]  ;;  %v2765_v63 = vcombine.low %v1868_v53, %v1872_v61 }
0x1c37   :  { %3021 = vrcp.f32 %v1777_v14  ;;  %v2777_v14 = vcombine.low %v1882_v44, %v1886_v46  ;;  %v942_v44 = vld [vmem:[#allocation7 + $0x28] sm:$0xff]  ;;  %v2787_v46 = vcombine.low %v1891_v37, %v1895_v36  ;;  %v960_v37 = vld [vmem:[#allocation7 + $0xb8] sm:$0xff] }
0x1c41   :  { %v3022_v34 = vpop.eup %3021 }
0x1ca8   :  { %v1771_v1 = vpop.permute.xlu0 %1770 }
0x1ca9   :  { %v1773_v33 = vadd.f32 %v1771_v1, %v1767_v29  ;;  %v1894_v29 = vld [vmem:[#allocation7 + $0x1e8] sm:$0xff]  ;;  %v2784_v1 = vcombine.high %v1889_v50, %v1893_v20 }
0x1cab   :  { %3023 = vtanh.f32 %v1773_v33  ;;  %v1847_v17 = vrot.slane %v1773_v33, 6  ;;  %v2786_v33 = vcombine.high %v1890_v62, %v1894_v29 }
0x1cb5   :  { %v3024_v57 = vpop.eup %3023 }
0x1cb6   :  { %v1781_v2 = vmul.f32 %v3024_v57, %v3022_v34  ;;  %v2783_v34 = vcombine.low %v1889_v50, %v1893_v20  ;;  %v2785_v57 = vcombine.low %v1890_v62, %v1894_v29  ;;  %v945_v50 = vld [vmem:[#allocation7 + $0x40] sm:$0xff] }
0x1cb7   :  { %v953_v62 = vld [vmem:[#allocation7 + $0x80] sm:$0xff] }
0x1cb8   :  { %v1782_v54 = vpack.c.bf16 %v1781_v2, %v1781_v2  ;;  %v2764_v2 = vcombine.high %v1867_v16, %v1871_v19  ;;  %v949_v16 = vld [vmem:[#allocation7 + $0x60] sm:$0xff]  ;;  %v946_v19 = vld [vmem:[#allocation7 + $0x48] sm:$0xff] }
0x1cb9   :  { %v957_v29 = vld [vmem:[#allocation7 + $0xa0] sm:$0xff] }
0x1cba   :  { %v1784_v3 = vrot.slane %v1782_v54, 2  ;;  %v2766_v54 = vcombine.high %v1868_v53, %v1872_v61  ;;  %v2804_v53 = vcombine.high %v945_v50, %v949_v16 }
0x1cbc   :  { %1785 = vrot.lane.b32.xlu1 %v1784_v3, %s3137_s6 }
0x1d2e   :  { %v1786_v4 = vpop.permute.xlu1 %1785 }
0x1d2f   :  { %2756 = vmatmul.mubr.msk.bf16.vlgmr.msra.gmra.mrb[36].mxu1 %vm281_vm2, %v1786_v4 }
0x1d30   :  { %2137 = vmatprep.mubr.bf16.mxu1 %v3136_v0  ;;  %2106 = vmatpush1.bf16.msra.mxu1 %v2761_v22  ;;  %v1896_v22 = vld [vmem:[#allocation7 + $0x1f8] sm:$0xff] }
0x1d31   :  { %2107 = vmatprep.subr.bf16.mxu1 %v2770_v41  ;;  %v2790_v45 = vcombine.high %v1892_v60, %v1896_v22  ;;  %v941_v41 = vld [vmem:[#allocation7 + $0x20] sm:$0xff] }
0x1d32   :  { %v2795_v20 = vcombine.low %v937_v55, %v941_v41 }
0x1d34   :  { %2108 = vmatpush1.bf16.msra.mxu1 %v2769_v48  ;;  %v2796_v48 = vcombine.high %v937_v55, %v941_v41  ;;  %v968_v55 = vld [vmem:[#allocation7 + $0xf8] sm:$0xff] }
0x1d35   :  { %2109 = vmatprep.subr.bf16.mxu1 %v2778_v51  ;;  %v950_v51 = vld [vmem:[#allocation7 + $0x68] sm:$0xff] }
0x1d36   :  { %v2806_v61 = vcombine.high %v946_v19, %v950_v51 }
0x1d38   :  { %2110 = vmatpush1.bf16.msra.mxu1 %v2777_v14  ;;  %v2803_v14 = vcombine.low %v945_v50, %v949_v16 }
0x1d39   :  { %2111 = vmatprep.subr.bf16.mxu1 %v2786_v33  ;;  %v2812_v33 = vcombine.high %v953_v62, %v957_v29 }
0x1d3c   :  { %2112 = vmatpush1.bf16.msra.mxu1 %v2785_v57  ;;  %v961_v57 = vld [vmem:[#allocation7 + $0xc0] sm:$0xff] }
0x1d3d   :  { %2187 = vmatprep.subr.bf16.mxu1 %v2766_v54  ;;  %v962_v54 = vld [vmem:[#allocation7 + $0xc8] sm:$0xff] }
0x1e02   :  { %v1824_v5 = vpop.f32.mrb[36].mxu1 }
0x1e03   :  { %v1833_v58 = vrot.slane %v1824_v5, 2  ;;  %v1826_v6 = vpop.f32.mrb[37].mxu1 }
0x1e04   :  { %v1828_v7 = vpop.f32.mrb[38].mxu1  ;;  %v1834_v49 = vrot.slane %v1826_v6, 2 }
0x1e05   :  { %v1837_v8 = vadd.f32 %v1833_v58, %v3462_v21  ;;  %v1829_v10 = vpop.f32.mrb[39].mxu1 }
0x1e06   :  { %v3560_v12 = vadd.f32 %v1834_v49, %v3470_v32  ;;  %v1865_v32 = vld [vmem:[#allocation7 + $0x100] sm:$0xff] }
0x1e07   :  { %v2757_v11 = vmul.f32 -1.442695, %v1837_v8  ;;  %v2759_v56 = vcombine.low %v1865_v32, %v1869_v52  ;;  %v2760_v59 = vcombine.high %v1865_v32, %v1869_v52  ;;  %v1884_v32 = vld [vmem:[#allocation7 + $0x198] sm:$0xff] }
0x1e08   :  { %v2758_v3 = vmul.f32 -1.442695, %v3560_v12 }
0x1e09   :  { %3025 = vpow2.f32 %v2757_v11  ;;  %2064 = vmatprep.subr.bf16.mxu0 %v2760_v59 }
0x1e0a   :  { %3027 = vtanh.f32 %v3560_v12  ;;  %2065 = vmatpush1.bf16.msra.mxu0 %v2759_v56 }
0x1e0b   :  { %2066 = vmatprep.subr.bf16.mxu0 %v2768_v39 }
0x1e0e   :  { %2067 = vmatpush1.bf16.msra.mxu0 %v2767_v47  ;;  %v2789_v47 = vcombine.low %v1892_v60, %v1896_v22 }
0x1e0f   :  { %2068 = vmatprep.subr.bf16.mxu0 %v2776_v15  ;;  %v2798_v15 = vcombine.high %v938_v43, %v942_v44 }
0x1e12   :  { %2069 = vmatpush1.bf16.msra.mxu0 %v2775_v31  ;;  %v958_v31 = vld [vmem:[#allocation7 + $0xa8] sm:$0xff] }
0x1e13   :  { %v3026_v13 = vpop.eup %3025  ;;  %2070 = vmatprep.subr.bf16.mxu0 %v2784_v1  ;;  %v2805_v1 = vcombine.low %v946_v19, %v950_v51 }
0x1e14   :  { %v1842_v26 = vadd.f32 1.0, %v3026_v13  ;;  %v3028_v42 = vpop.eup %3027  ;;  %v1875_v13 = vld [vmem:[#allocation7 + $0x150] sm:$0xff] }
0x1e16   :  { %3029 = vrcp.f32 %v1842_v26  ;;  %2071 = vmatpush1.bf16.msra.mxu0 %v2783_v34  ;;  %v1879_v26 = vld [vmem:[#allocation7 + $0x170] sm:$0xff] }
0x1e17   :  { %2146 = vmatprep.subr.bf16.mxu0 %v2764_v2  ;;  %3031 = vpow2.f32 %v2758_v3  ;;  %v2772_v12 = vcombine.high %v1875_v13, %v1879_v26  ;;  %v2771_v52 = vcombine.low %v1875_v13, %v1879_v26  ;;  %v965_v2 = vld [vmem:[#allocation7 + $0xe0] sm:$0xff]  ;;  %v966_v3 = vld [vmem:[#allocation7 + $0xe8] sm:$0xff] }
0x1e18   :  { %v2821_v13 = vcombine.low %v962_v54, %v966_v3 }
0x1e20   :  { %v3030_v9 = vpop.eup %3029 }
0x1e21   :  { %v1850_v23 = vmul.f32 %v3030_v9, %v3028_v42  ;;  %v3565_v21 = vmul.f32 %v3030_v9, %v1847_v17  ;;  %v3032_v4 = vpop.eup %3031  ;;  %v1876_v42 = vld [vmem:[#allocation7 + $0x158] sm:$0xff] }
0x1e22   :  { %v1859_v5 = vadd.f32 1.0, %v3032_v4  ;;  %v1880_v17 = vld [vmem:[#allocation7 + $0x178] sm:$0xff]  ;;  %v2811_v4 = vcombine.low %v953_v62, %v957_v29 }
0x1e23   :  { %1852 = vrot.lane.b32.xlu0 %v1850_v23, %s3137_s6  ;;  %v2774_v9 = vcombine.high %v1876_v42, %v1880_v17  ;;  %v1883_v23 = vld [vmem:[#allocation7 + $0x190] sm:$0xff]  ;;  %v2773_v35 = vcombine.low %v1876_v42, %v1880_v17 }
0x1e24   :  { %3033 = vrcp.f32 %v1859_v5  ;;  %v947_v17 = vld [vmem:[#allocation7 + $0x50] sm:$0xff] }
0x1e27   :  { %2230 = vrot.lane.b32.xlu0 %v2229_v18, %s3137_s6  ;;  %v1887_v18 = vld [vmem:[#allocation7 + $0x1b0] sm:$0xff] }
0x1e28   :  { %v2780_v56 = vcombine.high %v1883_v23, %v1887_v18  ;;  %v2779_v38 = vcombine.low %v1883_v23, %v1887_v18  ;;  %v952_v23 = vld [vmem:[#allocation7 + $0x78] sm:$0xff] }
0x1e2e   :  { %v3034_v7 = vpop.eup %3033 }
0x1e95   :  { %v1853_v58 = vpop.permute.xlu0 %1852 }
0x1e96   :  { %v1855_v6 = vadd.f32 %v1853_v58, %v3565_v21  ;;  %v1888_v21 = vld [vmem:[#allocation7 + $0x1b8] sm:$0xff]  ;;  %v2820_v58 = vcombine.high %v961_v57, %v965_v2 }
0x1e97   :  { %v2782_v59 = vcombine.high %v1884_v32, %v1888_v21  ;;  %v2781_v39 = vcombine.low %v1884_v32, %v1888_v21 }
0x1e98   :  { %3035 = vtanh.f32 %v1855_v6  ;;  %v2822_v6 = vcombine.high %v962_v54, %v966_v3  ;;  %v2574_v54 = vsub.s32 3, %v3267_v27 }
0x1ea2   :  { %v3036_v8 = vpop.eup %3035 }
0x1ea3   :  { %v1863_v10 = vmul.f32 %v3036_v8, %v3034_v7  ;;  %v939_v7 = vld [vmem:[#allocation7 + $0x10] sm:$0xff] }
0x1ea4   :  { %v943_v8 = vld [vmem:[#allocation7 + $0x30] sm:$0xff] }
0x1ea5   :  { %v1864_v11 = vpack.c.bf16 %v1863_v10, %v1863_v10  ;;  %v940_v10 = vld [vmem:[#allocation7 + $0x18] sm:$0xff]  ;;  %v2800_v26 = vcombine.high %v939_v7, %v943_v8 }
0x1ea7   :  { %v1898_v49 = vrot.slane %v1864_v11, 3  ;;  %v944_v11 = vld [vmem:[#allocation7 + $0x38] sm:$0xff] }
0x1ea8   :  { %v2802_v42 = vcombine.high %v940_v10, %v944_v11  ;;  %v2801_v18 = vcombine.low %v940_v10, %v944_v11 }
0x1ea9   :  { %1899 = vrot.lane.b32.xlu1 %v1898_v49, %s3137_s6  ;;  %v2819_v49 = vcombine.low %v961_v57, %v965_v2  ;;  %v3138_v57 = vmov 1983009808  }
0x1eaa   :  { %v2619_v2 = vunpack.c.l.s4 %v3138_v57 }
0x1f1b   :  { %v1900_v24 = vpop.permute.xlu1 %1899 }
0x1f1c   :  { %2791 = vmatmul.mubr.msk.bf16.vlgmr.msra.gmra.mrb[40].mxu0 %vm281_vm2, %v1900_v24  ;;  %2792 = vmatmul.mubr.msk.bf16.vlgmr.msra.gmra.mrb[40].mxu1 %vm281_vm2, %v1900_v24 }
0x1f1d   :  { %2147 = vmatpush1.bf16.msra.mxu0 %v2763_v25  ;;  %2188 = vmatpush1.bf16.msra.mxu1 %v2765_v63  ;;  %v2797_v25 = vcombine.low %v938_v43, %v942_v44  ;;  %v954_v63 = vld [vmem:[#allocation7 + $0x88] sm:$0xff] }
0x1f1e   :  { %2148 = vmatprep.subr.bf16.mxu0 %v2772_v12  ;;  %2189 = vmatprep.subr.bf16.mxu1 %v2774_v9  ;;  %v2814_v34 = vcombine.high %v954_v63, %v958_v31  ;;  %v2813_v5 = vcombine.low %v954_v63, %v958_v31  ;;  %v951_v12 = vld [vmem:[#allocation7 + $0x70] sm:$0xff]  ;;  %v948_v9 = vld [vmem:[#allocation7 + $0x58] sm:$0xff] }
0x1f1f   :  { %2178 = vmatprep.mubr.bf16.mxu0 %v3136_v0  ;;  %2219 = vmatprep.mubr.bf16.mxu1 %v3136_v0  ;;  %v2808_v32 = vcombine.high %v947_v17, %v951_v12  ;;  %v2810_v21 = vcombine.high %v948_v9, %v952_v23  ;;  %v2807_v36 = vcombine.low %v947_v17, %v951_v12 }
0x1f20   :  { %v2809_v60 = vcombine.low %v948_v9, %v952_v23 }
0x1f21   :  { %2149 = vmatpush1.bf16.msra.mxu0 %v2771_v52  ;;  %2190 = vmatpush1.bf16.msra.mxu1 %v2773_v35  ;;  %v955_v52 = vld [vmem:[#allocation7 + $0x90] sm:$0xff]  ;;  %v2231_v35 = vpop.permute.xlu0 %2230 }
0x1f22   :  { %2150 = vmatprep.subr.bf16.mxu0 %v2780_v56  ;;  %2191 = vmatprep.subr.bf16.mxu1 %v2782_v59  ;;  %v959_v56 = vld [vmem:[#allocation7 + $0xb0] sm:$0xff]  ;;  %v956_v59 = vld [vmem:[#allocation7 + $0x98] sm:$0xff] }
0x1f23   :  { %v2816_v22 = vcombine.high %v955_v52, %v959_v56  ;;  %v2815_v41 = vcombine.low %v955_v52, %v959_v56  ;;  %v2817_v43 = vcombine.low %v956_v59, %v960_v37 }
0x1f25   :  { %2151 = vmatpush1.bf16.msra.mxu0 %v2779_v38  ;;  %2192 = vmatpush1.bf16.msra.mxu1 %v2781_v39  ;;  %v2818_v38 = vcombine.high %v956_v59, %v960_v37  ;;  %v963_v39 = vld [vmem:[#allocation7 + $0xd0] sm:$0xff]  ;;  %v2578_v37 = vsub.s32 4, %v3267_v27 }
0x1f26   :  { %2152 = vmatprep.subr.bf16.mxu0 %v2788_v40  ;;  %2193 = vmatprep.subr.bf16.mxu1 %v2790_v45  ;;  %v967_v40 = vld [vmem:[#allocation7 + $0xf0] sm:$0xff]  ;;  %v964_v45 = vld [vmem:[#allocation7 + $0xd8] sm:$0xff] }
0x1f27   :  { %v2824_v44 = vcombine.high %v963_v39, %v967_v40 }
0x1f29   :  { %2153 = vmatpush1.bf16.msra.mxu0 %v2787_v46  ;;  %2194 = vmatpush1.bf16.msra.mxu1 %v2789_v47  ;;  %v2826_v46 = vcombine.high %v964_v45, %v968_v55  ;;  %v2823_v47 = vcombine.low %v963_v39, %v967_v40 }
0x1f2a   :  { %2395 = vmatprep.subr.bf16.mxu0 %v2796_v48  ;;  %2436 = vmatprep.subr.bf16.mxu1 %v2798_v15  ;;  %v2825_v48 = vcombine.low %v964_v45, %v968_v55 }
0x1f2c   :  { %2793 = vmatmul.mubr.msk.bf16.vlgmr.msra.gmra.mrb[44].mxu0 %vm281_vm2, %v1900_v24  ;;  %2794 = vmatmul.mubr.msk.bf16.vlgmr.msra.gmra.mrb[44].mxu1 %vm281_vm2, %v1900_v24  ;;  %v2799_v24 = vcombine.low %v939_v7, %v943_v8  ;;  %v2620_v7 = vunpack.c.0.s8 %v2619_v2 }
0x1f2d   :  { %2396 = vmatpush1.bf16.msra.mxu0 %v2795_v20  ;;  %2437 = vmatpush1.bf16.msra.mxu1 %v2797_v25 }
0x1f2e   :  { %2397 = vmatprep.subr.bf16.mxu0 %v2804_v53  ;;  %2438 = vmatprep.subr.bf16.mxu1 %v2806_v61 }
0x1f2f   :  { %2427 = vmatprep.mubr.bf16.mxu0 %v3136_v0  ;;  %2468 = vmatprep.mubr.bf16.mxu1 %v3136_v0 }
0x1f31   :  { %2398 = vmatpush1.bf16.msra.mxu0 %v2803_v14  ;;  %2439 = vmatpush1.bf16.msra.mxu1 %v2805_v1 }
0x1f32   :  { %2399 = vmatprep.subr.bf16.mxu0 %v2812_v33  ;;  %2440 = vmatprep.subr.bf16.mxu1 %v2814_v34  ;;  %v2570_v33 = vsub.s32 2, %v3267_v27  ;;  %v95_v34 = vld [vmem:[%s3614_s4 + $0x4] sm:$0xff]  ;;  %s3139_s4 = smov [#allocation8]  }
0x1f33   :  { %v2563_v3 = vrot.slane %v95_v34, %v3270_v28  ;;  %v2575_v8 = vrot.slane %v95_v34, %v2574_v54  ;;  %s2660_s11 = sshll.u32 %s3139_s4, 4  ;;  %s2661_s11 = int_to_ptr.vmem [resolvable:$true] %s2660_s11 }
0x1f34   :  { %s3103_s12 = scalar_lea.vmem %s2661_s11, 256  ;;  %p3108_p11 = scmp.lt.s32.totalorder %s2661_s11, %s2661_s11 }
0x1f35   :  { %2400 = vmatpush1.bf16.msra.mxu0 %v2811_v4  ;;  %2441 = vmatpush1.bf16.msra.mxu1 %v2813_v5  ;;  %v2571_v4 = vrot.slane %v95_v34, %v2570_v33  ;;  %p3104_p10 = scmp.ne.s32.totalorder %s2661_s11, %s3103_s12  ;;  %p3109_p12 = scmp.lt.s32.totalorder %s3103_s12, %s3103_s12 }
0x1f36   :  { %2401 = vmatprep.subr.bf16.mxu0 %v2820_v58  ;;  %2442 = vmatprep.subr.bf16.mxu1 %v2822_v6  ;;  %v2567_v6 = vrot.slane %v95_v34, %v3276_v30 }
0x1f37   :  { %p3110_p13 = por %p3109_p12, %p3108_p11 }
0x1f39   :  { %2402 = vmatpush1.bf16.msra.mxu0 %v2819_v49  ;;  %2443 = vmatpush1.bf16.msra.mxu1 %v2821_v13  ;;  %p3111_p0 = pnand %p3110_p13, %p3104_p10 }
0x1f3a   :  { %2477 = vmatprep.subr.bf16.mxu0 %v2800_v26  ;;  %2518 = vmatprep.subr.bf16.mxu1 %v2802_v42 }
0x1f3c   :  { %2827 = vmatmul.mubr.msk.bf16.vlgmr.msra.gmra.mrb[48].mxu0 %vm281_vm2, %v2231_v35  ;;  %2828 = vmatmul.mubr.msk.bf16.vlgmr.msra.gmra.mrb[48].mxu1 %vm281_vm2, %v2231_v35 }
0x1f3d   :  { %2478 = vmatpush1.bf16.msra.mxu0 %v2799_v24  ;;  %2519 = vmatpush1.bf16.msra.mxu1 %v2801_v18 }
0x1f3e   :  { %2479 = vmatprep.subr.bf16.mxu0 %v2808_v32  ;;  %2520 = vmatprep.subr.bf16.mxu1 %v2810_v21  ;;  %v2623_v32 = vsub.s32 %v2620_v7, %v3267_v27 }
0x1f3f   :  { %2509 = vmatprep.mubr.bf16.mxu0 %v3136_v0  ;;  %2550 = vmatprep.mubr.bf16.mxu1 %v3136_v0 }
0x1f41   :  { %2480 = vmatpush1.bf16.msra.mxu0 %v2807_v36  ;;  %2521 = vmatpush1.bf16.msra.mxu1 %v2809_v60  ;;  %v2586_v36 = vsub.s32 6, %v3267_v27  ;;  %v2582_v60 = vsub.s32 5, %v3267_v27 }
0x1f42   :  { %2481 = vmatprep.subr.bf16.mxu0 %v2816_v22  ;;  %2522 = vmatprep.subr.bf16.mxu1 %v2818_v38  ;;  %v2590_v22 = vsub.s32 7, %v3267_v27  ;;  %v2579_v38 = vrot.slane %v95_v34, %v2578_v37 }
0x1f43   :  { %v2587_v39 = vrot.slane %v95_v34, %v2586_v36  ;;  %v2583_v55 = vrot.slane %v95_v34, %v2582_v60 }
0x1f45   :  { %2482 = vmatpush1.bf16.msra.mxu0 %v2815_v41  ;;  %2523 = vmatpush1.bf16.msra.mxu1 %v2817_v43  ;;  %v2591_v41 = vrot.slane %v95_v34, %v2590_v22 }
0x1f46   :  { %2483 = vmatprep.subr.bf16.mxu0 %v2824_v44  ;;  %2524 = vmatprep.subr.bf16.mxu1 %v2826_v46 }
0x1f49   :  { %2484 = vmatpush1.bf16.msra.mxu0 %v2823_v47  ;;  %2525 = vmatpush1.bf16.msra.mxu1 %v2825_v48 }
0x1f4c   :  { %2829 = vmatmul.mubr.msk.bf16.vlgmr.msra.gmra.mrb[52].mxu0 %vm281_vm2, %v2231_v35  ;;  %2830 = vmatmul.mubr.msk.bf16.vlgmr.msra.gmra.mrb[52].mxu1 %vm281_vm2, %v2231_v35 }
0x1fef   :  { %v2098_v0 = vpop.f32.mrb[40].mxu0  ;;  %v2139_v15 = vpop.f32.mrb[40].mxu1 }
0x1ff0   :  { %v2100_v50 = vpop.f32.mrb[41].mxu0  ;;  %v2141_v16 = vpop.f32.mrb[41].mxu1 }
0x1ff1   :  { %v2102_v19 = vpop.f32.mrb[42].mxu0  ;;  %v2143_v51 = vpop.f32.mrb[42].mxu1 }
0x1ff2   :  { %v2103_v20 = vpop.f32.mrb[43].mxu0  ;;  %v2144_v25 = vpop.f32.mrb[43].mxu1 }
0x1fff   :  { %v2180_v53 = vpop.f32.mrb[44].mxu0  ;;  %v2221_v61 = vpop.f32.mrb[44].mxu1 }
0x2000   :  { %v2182_v62 = vpop.f32.mrb[45].mxu0  ;;  %v2223_v29 = vpop.f32.mrb[45].mxu1 }
0x2001   :  { %v2184_v63 = vpop.f32.mrb[46].mxu0  ;;  %v2225_v31 = vpop.f32.mrb[46].mxu1 }
0x2002   :  { %v2185_v14 = vpop.f32.mrb[47].mxu0  ;;  %v2226_v1 = vpop.f32.mrb[47].mxu1 }
0x200f   :  { %v2429_v5 = vpop.f32.mrb[48].mxu0  ;;  %v2470_v58 = vpop.f32.mrb[48].mxu1 }
0x2010   :  { %v2430_v10 = vadd.f32 %v2429_v5, %v2098_v0  ;;  %v2471_v11 = vadd.f32 %v2470_v58, %v2139_v15  ;;  %v2431_v49 = vpop.f32.mrb[49].mxu0  ;;  %v2472_v13 = vpop.f32.mrb[49].mxu1 }
0x2011   :  { %v2432_v26 = vadd.f32 %v2431_v49, %v2100_v50  ;;  %v2473_v42 = vadd.f32 %v2472_v13, %v2141_v16  ;;  %v2433_v17 = vpop.f32.mrb[50].mxu0  ;;  %v2474_v12 = vpop.f32.mrb[50].mxu1 }
0x2012   :  { %v2600_v9 = vadd.f32 %v2563_v3, %v2430_v10  ;;  %v2602_v23 = vadd.f32 %v2571_v4, %v2471_v11  ;;  %v2434_v24 = vpop.f32.mrb[51].mxu0  ;;  %v2475_v18 = vpop.f32.mrb[51].mxu1 }
0x2013   :  { %v2601_v28 = vadd.f32 %v2567_v6, %v2432_v26  ;;  %v2603_v21 = vadd.f32 %v2575_v8, %v2473_v42 }
0x2015   :  { %v2616_v52 = vcombine.low %v2600_v9, %v2601_v28  ;;  %v2617_v30 = vcombine.low %v2602_v23, %v2603_v21 }
0x2017   :  { %v2624_v35 = vrot.slane %v2616_v52, %v2623_v32  ;;  %v2631_v56 = vrot.slane %v2617_v30, %v2623_v32 }
0x2019   :  { %v2632_v59 = vcombine.low %v2624_v35, %v2631_v56 }
0x201b   :  { %2652 = vst [vmem:[#allocation8] sm:$0xff] %v2632_v59 }
0x201f   :  { %v2511_v40 = vpop.f32.mrb[52].mxu0  ;;  %v2552_v45 = vpop.f32.mrb[52].mxu1 }
0x2020   :  { %v2512_v43 = vadd.f32 %v2511_v40, %v2180_v53  ;;  %v2553_v44 = vadd.f32 %v2552_v45, %v2221_v61  ;;  %v2513_v46 = vpop.f32.mrb[53].mxu0  ;;  %v2554_v47 = vpop.f32.mrb[53].mxu1 }
0x2021   :  { %v2514_v48 = vadd.f32 %v2513_v46, %v2182_v62  ;;  %v2555_v0 = vadd.f32 %v2554_v47, %v2223_v29  ;;  %v2515_v15 = vpop.f32.mrb[54].mxu0  ;;  %v2556_v50 = vpop.f32.mrb[54].mxu1 }
0x2022   :  { %v2604_v16 = vadd.f32 %v2579_v38, %v2512_v43  ;;  %v2606_v19 = vadd.f32 %v2587_v39, %v2553_v44  ;;  %v2516_v51 = vpop.f32.mrb[55].mxu0  ;;  %v2557_v20 = vpop.f32.mrb[55].mxu1 }
0x2023   :  { %v2605_v27 = vadd.f32 %v2583_v55, %v2514_v48  ;;  %v2607_v25 = vadd.f32 %v2591_v41, %v2555_v0 }
0x2025   :  { %v2633_v63 = vcombine.low %v2604_v16, %v2605_v27  ;;  %v2634_v31 = vcombine.low %v2606_v19, %v2607_v25 }
0x2027   :  { %v2641_v14 = vrot.slane %v2633_v63, %v2623_v32  ;;  %v2648_v1 = vrot.slane %v2634_v31, %v2623_v32 }
0x2029   :  { %v2649_v53 = vcombine.low %v2641_v14, %v2648_v1 }
0x202b   :  { %2653 = vst [vmem:[#allocation8 + $0x8] sm:$0xff] %v2649_v53 }
0x202c   :  { %3114 = shalt.err (!%p3111_p0)
}
0x202d   :  { %s3115_s15 = scalar_lea.hbm %s3615_s5, 256 }
0x202e   :  { %p3116_p1 = scmp.ne.s32.totalorder %s3615_s5, %s3115_s15  ;;  %p3119_p2 = scmp.lt.u32.totalorder %s3115_s15, %s3615_s5 }
0x2030   :  { %p3121_p3 = pnand %p3119_p2, %p3116_p1 }
0x2032   :  { %3124 = shalt.err (!%p3121_p3)
}
0x2033   :  { %2663 = dma.vmem_to_hbm [thread:$0]  %s2661_s11, 256, %s3615_s5, [#allocation4]  }
0x2034   :  { %3129 = dma.done.wait [#allocation4], 256  }
0x2035   :  { %3130 = vsyncadd [#allocation4], 4294967040 }
0x2036   :  { %2667 = vsyncpa [#allocation3], 1 }
0x2037   :  { %2668 = vsyncpa [#allocation6], 1 }
0x2038   :  { %2669 = vsyncpa [#allocation4], 1 }

</bundles_post_ra>
